<compile_context>
chip_gen: v5e
topology: v5e:2x2
jax: 0.10.0
libtpu: 0.0.40
codegen_flags: <defaults>
</compile_context>

<pallas_src>
import jax
import jax.numpy as jnp
from jax.experimental import pallas as pl
from jax.experimental.pallas import tpu as pltpu


D_PAD = 128     # lane width: hidden / output feature dims are zero-padded to this
MAX_TB = 1024   # batch-tile rows for large batches (single tile when B <= MAX_TB)


def _round_up(x, m):
    return ((x + m - 1) // m) * m


def actor_kernel(x_ref, w1c_ref, w_ref, b_ref, o_ref):
    """Fused 3-layer MLP for one (tb, state_dim) batch tile.

    x_ref   : (tb, state_dim)   raw state tile (unpadded K)
    w1c_ref : (state_dim, 128)  (W1 @ W_emb)^T, zero-padded along N
    w_ref   : (2, 128, 128)     [W2^T, W3^T], zero-padded
    b_ref   : (3, 128)          [b1, b2, b3], zero-padded
    o_ref   : (tb, 128)         padded sigmoid output (cols >= action_dim are junk)
    """
    x = x_ref[...]
    b = b_ref[...]

    # Layer 1 with the external state_embedding folded in: relu(x @ (W1 W_emb)^T + b1)
    h1 = jnp.maximum(
        jnp.dot(x, w1c_ref[...], preferred_element_type=jnp.float32) + b[0:1, :], 0.0)
    h2 = jnp.maximum(
        jnp.dot(h1, w_ref[0], preferred_element_type=jnp.float32) + b[1:2, :], 0.0)
    logits = jnp.dot(h2, w_ref[1], preferred_element_type=jnp.float32) + b[2:3, :]

    # Numerically stable sigmoid: exp on the EUP, single divide.
    z = jnp.exp(-jnp.abs(logits))
    num = jnp.where(logits >= 0.0, 1.0, z)
    o_ref[...] = num / (1.0 + z)


def actor_forward(x, w1c, w_pack, b_pack, action_dim, tb=None):
    """Run the fused Actor forward. x: (B, state_dim) f32 -> (B, action_dim) f32."""
    B, state_dim = x.shape
    if tb is None:
        # Small B: one grid step covering the whole (8-aligned) batch.
        # Large B: 1024-row tiles (amortize per-step overhead, stay well under
        # the default scoped-VMEM limits on all generations).
        tb = _round_up(min(B, MAX_TB), 8)
    n_tiles = pl.cdiv(B, tb)
    b_pad = n_tiles * tb
    x_p = x if b_pad == B else jnp.pad(x, ((0, b_pad - B), (0, 0)))

    out = pl.pallas_call(
        actor_kernel,
        out_shape=jax.ShapeDtypeStruct((b_pad, D_PAD), jnp.float32),
        grid=(n_tiles,),
        in_specs=[
            # activations: one batch tile per grid step, K kept at state_dim
            pl.BlockSpec((tb, state_dim), lambda i: (i, 0)),
            # weights / biases: constant index_map -> VMEM-resident across steps
            pl.BlockSpec((state_dim, D_PAD), lambda i: (0, 0)),
            pl.BlockSpec((2, D_PAD, D_PAD), lambda i: (0, 0, 0)),
            pl.BlockSpec((3, D_PAD), lambda i: (0, 0)),
        ],
        # Lane-dense (tb, 128) output slab; wrapper slices the real action_dim cols.
        out_specs=pl.BlockSpec((tb, D_PAD), lambda i: (i, 0)),
        compiler_params=pltpu.CompilerParams(
            dimension_semantics=("parallel",)),   # 2x on v7x megacore for large B
    )(x_p, w1c, w_pack, b_pack)

    return out[:B, :action_dim]


def xavier_normal(key, fan_out, fan_in):
    """Matches torch.nn.init.xavier_normal_ for a (fan_out, fan_in) weight."""
    std = jnp.sqrt(2.0 / (fan_in + fan_out))
    return std * jax.random.normal(key, (fan_out, fan_in), dtype=jnp.float32)


def make_actor_params(key, state_dim, ls, action_dim):
    """Params following Actor.reset_params (xavier weights, zero bias), torch (out,in) layout.

    TODO(synk): `state_embedding` is an external module passed into forward(); it is
    stood in by a deterministic bias-free linear embedding (folded into W1 below).
    """
    k_emb, k1, k2, k3 = jax.random.split(key, 4)
    w_emb = xavier_normal(k_emb, ls, state_dim)      # (ls, state_dim)
    w_l1 = xavier_normal(k1, ls, ls)
    w_l2 = xavier_normal(k2, ls, ls)
    w_out = xavier_normal(k3, action_dim, ls)
    b1 = jnp.zeros((ls,), jnp.float32)
    b2 = jnp.zeros((ls,), jnp.float32)
    b3 = jnp.zeros((action_dim,), jnp.float32)
    return (w_emb, w_l1, b1, w_l2, b2, w_out, b3)


def pack_params(params, state_dim):
    """Coalesce parameters for the kernel.

    * Fold the embedding into layer 1 on the host: W1c = W1 @ W_emb (pure algebra,
      no nonlinearity between them), transposed to (state_dim, ls) and zero-padded
      to (state_dim, 128).
    * W2, W3 transposed from torch (out, in) to (in, out) and zero-padded to (128, 128).
    * Biases b1, b2, b3 zero-padded to (128,).
    """
    w_emb, w1, b1, w2, b2, w3, b3 = params

    w1c_t = jnp.dot(w1, w_emb, precision="highest").T            # (state_dim, ls)
    w1c = jnp.zeros((state_dim, D_PAD), jnp.float32).at[:, :w1c_t.shape[1]].set(w1c_t)

    def padw(w_torch):
        wt = w_torch.T
        return jnp.zeros((D_PAD, D_PAD), jnp.float32).at[:wt.shape[0], :wt.shape[1]].set(wt)

    def padb(b):
        return jnp.zeros((D_PAD,), jnp.float32).at[:b.shape[0]].set(b)

    w_pack = jnp.stack([padw(w2), padw(w3)])                      # (2, 128, 128)
    b_pack = jnp.stack([padb(b1), padb(b2), padb(b3)])            # (3, 128)
    return w1c, w_pack, b_pack


if __name__ == "__main__":
    # Small shapes consistent with the module: args.ls = 32, args.action_dim = 8.
    # batch=200 -> single grid step (tb=200, 8-aligned), no batch padding needed.
    batch, state_dim, ls, action_dim = 200, 16, 32, 8

    key = jax.random.PRNGKey(0)
    k_in, k_params = jax.random.split(key, 2)

    x = jax.random.normal(k_in, (batch, state_dim), dtype=jnp.float32)

    params = make_actor_params(k_params, state_dim, ls, action_dim)
    w1c, w_pack, b_pack = pack_params(params, state_dim)

    out = actor_forward(x, w1c, w_pack, b_pack, action_dim)
    out = jax.block_until_ready(out)

    # Pure-JAX reference of the same forward pass (unfolded weights, high precision).
    w_emb, w1, b1, w2, b2, w3, b3 = params
    s_z = jnp.dot(x, w_emb.T, precision="highest")
    h1 = jnp.maximum(jnp.dot(s_z, w1.T, precision="highest") + b1, 0.0)
    h2 = jnp.maximum(jnp.dot(h1, w2.T, precision="highest") + b2, 0.0)
    ref = jax.nn.sigmoid(jnp.dot(h2, w3.T, precision="highest") + b3)

    assert out.shape == (batch, action_dim)
    # Tolerance accommodates MXU f32-via-bf16-pass matmuls and the host-side
    # embedding fold (re-association); values are post-sigmoid in [0, 1].
    assert jnp.allclose(out, ref, atol=2e-3, rtol=2e-3), float(jnp.max(jnp.abs(out - ref)))

    print("KERNEL_OK")
</pallas_src>

<mosaic_0001>
module attributes {stable_mosaic.version = 11 : i64} {
  func.func @actor_kernel(%arg0: i32, %arg1: memref<200x16xf32, #tpu.memory_space<vmem>>, %arg2: memref<16x128xf32, #tpu.memory_space<vmem>>, %arg3: memref<2x128x128xf32, #tpu.memory_space<vmem>>, %arg4: memref<3x128xf32, #tpu.memory_space<vmem>>, %arg5: memref<200x128xf32, #tpu.memory_space<vmem>>) attributes {dimension_semantics = [#tpu.dimension_semantics<parallel>], iteration_bounds = array<i64: 1>, scalar_prefetch = 0 : i64, scratch_operands = 0 : i64, tpu.core_type = #tpu.core_type<tc>, window_params = [{transform_indices = @transform_0, window_bounds = array<i64: 200, 16>}, {pipeline_mode = #tpu.pipeline_mode<synchronous>, transform_indices = @transform_1, window_bounds = array<i64: 16, 128>}, {pipeline_mode = #tpu.pipeline_mode<synchronous>, transform_indices = @transform_2, window_bounds = array<i64: 2, 128, 128>}, {pipeline_mode = #tpu.pipeline_mode<synchronous>, transform_indices = @transform_3, window_bounds = array<i64: 3, 128>}, {transform_indices = @transform_4, window_bounds = array<i64: 200, 128>}]} {
    %c0 = arith.constant 0 : index
    %c0_0 = arith.constant 0 : index
    %0 = vector.load %arg1[%c0, %c0_0] : memref<200x16xf32, #tpu.memory_space<vmem>>, vector<200x16xf32>
    %c0_1 = arith.constant 0 : index
    %c0_2 = arith.constant 0 : index
    %1 = vector.load %arg4[%c0_1, %c0_2] : memref<3x128xf32, #tpu.memory_space<vmem>>, vector<3x128xf32>
    %c0_3 = arith.constant 0 : index
    %c0_4 = arith.constant 0 : index
    %2 = vector.load %arg2[%c0_3, %c0_4] : memref<16x128xf32, #tpu.memory_space<vmem>>, vector<16x128xf32>
    %cst = arith.constant dense<0.000000e+00> : vector<200x128xf32>
    %3 = tpu.matmul %0, %2, %cst {dimension_numbers = #tpu.dot_dimension_numbers<[1], [0], [0], [1], [0, 0, 1, 1], [], []>} : vector<200x16xf32>, vector<16x128xf32>, vector<200x128xf32> -> vector<200x128xf32>
    %4 = vector.extract_strided_slice %1 {offsets = [0, 0], sizes = [1, 128], strides = [1, 1]} : vector<3x128xf32> to vector<1x128xf32>
    %5 = vector.broadcast %4 : vector<1x128xf32> to vector<200x128xf32>
    %6 = arith.addf %3, %5 : vector<200x128xf32>
    %cst_5 = arith.constant 0.000000e+00 : f32
    %7 = vector.broadcast %cst_5 : f32 to vector<200x128xf32>
    %8 = arith.maximumf %6, %7 : vector<200x128xf32>
    %c0_6 = arith.constant 0 : index
    %c0_7 = arith.constant 0 : index
    %c0_8 = arith.constant 0 : index
    %9 = vector.load %arg3[%c0_6, %c0_7, %c0_8] : memref<2x128x128xf32, #tpu.memory_space<vmem>>, vector<1x128x128xf32>
    %10 = vector.shape_cast %9 : vector<1x128x128xf32> to vector<128x128xf32>
    %cst_9 = arith.constant dense<0.000000e+00> : vector<200x128xf32>
    %11 = tpu.matmul %8, %10, %cst_9 {dimension_numbers = #tpu.dot_dimension_numbers<[1], [0], [0], [1], [0, 0, 1, 1], [], []>} : vector<200x128xf32>, vector<128x128xf32>, vector<200x128xf32> -> vector<200x128xf32>
    %12 = vector.extract_strided_slice %1 {offsets = [1, 0], sizes = [1, 128], strides = [1, 1]} : vector<3x128xf32> to vector<1x128xf32>
    %13 = vector.broadcast %12 : vector<1x128xf32> to vector<200x128xf32>
    %14 = arith.addf %11, %13 : vector<200x128xf32>
    %cst_10 = arith.constant 0.000000e+00 : f32
    %15 = vector.broadcast %cst_10 : f32 to vector<200x128xf32>
    %16 = arith.maximumf %14, %15 : vector<200x128xf32>
    %c1 = arith.constant 1 : index
    %c0_11 = arith.constant 0 : index
    %c0_12 = arith.constant 0 : index
    %17 = vector.load %arg3[%c1, %c0_11, %c0_12] : memref<2x128x128xf32, #tpu.memory_space<vmem>>, vector<1x128x128xf32>
    %18 = vector.shape_cast %17 : vector<1x128x128xf32> to vector<128x128xf32>
    %cst_13 = arith.constant dense<0.000000e+00> : vector<200x128xf32>
    %19 = tpu.matmul %16, %18, %cst_13 {dimension_numbers = #tpu.dot_dimension_numbers<[1], [0], [0], [1], [0, 0, 1, 1], [], []>} : vector<200x128xf32>, vector<128x128xf32>, vector<200x128xf32> -> vector<200x128xf32>
    %20 = vector.extract_strided_slice %1 {offsets = [2, 0], sizes = [1, 128], strides = [1, 1]} : vector<3x128xf32> to vector<1x128xf32>
    %21 = vector.broadcast %20 : vector<1x128xf32> to vector<200x128xf32>
    %22 = arith.addf %19, %21 : vector<200x128xf32>
    %23 = math.absf %22 : vector<200x128xf32>
    %cst_14 = arith.constant 0.000000e+00 : f32
    %24 = vector.broadcast %cst_14 : f32 to vector<200x128xf32>
    %25 = arith.subf %24, %23 : vector<200x128xf32>
    %26 = math.exp %25 : vector<200x128xf32>
    %cst_15 = arith.constant 0.000000e+00 : f32
    %27 = vector.broadcast %cst_15 : f32 to vector<200x128xf32>
    %28 = arith.cmpf oge, %22, %27 : vector<200x128xf32>
    %cst_16 = arith.constant 1.000000e+00 : f32
    %29 = vector.broadcast %cst_16 : f32 to vector<200x128xf32>
    %30 = arith.select %28, %29, %26 : vector<200x128xi1>, vector<200x128xf32>
    %cst_17 = arith.constant 1.000000e+00 : f32
    %31 = vector.broadcast %cst_17 : f32 to vector<200x128xf32>
    %32 = arith.addf %31, %26 : vector<200x128xf32>
    %33 = arith.divf %30, %32 : vector<200x128xf32>
    %c0_18 = arith.constant 0 : index
    %c0_19 = arith.constant 0 : index
    %34 = vector.load %arg5[%c0_18, %c0_19] : memref<200x128xf32, #tpu.memory_space<vmem>>, vector<200x128xf32>
    tpu.vector_store %arg5[%c0_18, %c0_19], %33 {strides = array<i32>} : memref<200x128xf32, #tpu.memory_space<vmem>>, vector<200x128xf32>,
    return
  }
  func.func @transform_0(%arg0: i32) -> (i32, i32) {
    %c0_i32 = arith.constant 0 : i32
    %c0_i32_0 = arith.constant 0 : i32
    return %arg0, %c0_i32 : i32, i32
  }
  func.func @transform_1(%arg0: i32) -> (i32, i32) {
    %c0_i32 = arith.constant 0 : i32
    %c0_i32_0 = arith.constant 0 : i32
    %c0_i32_1 = arith.constant 0 : i32
    return %c0_i32, %c0_i32_0 : i32, i32
  }
  func.func @transform_2(%arg0: i32) -> (i32, i32, i32) {
    %c0_i32 = arith.constant 0 : i32
    %c0_i32_0 = arith.constant 0 : i32
    %c0_i32_1 = arith.constant 0 : i32
    %c0_i32_2 = arith.constant 0 : i32
    return %c0_i32, %c0_i32_0, %c0_i32_1 : i32, i32, i32
  }
  func.func @transform_3(%arg0: i32) -> (i32, i32) {
    %c0_i32 = arith.constant 0 : i32
    %c0_i32_0 = arith.constant 0 : i32
    %c0_i32_1 = arith.constant 0 : i32
    return %c0_i32, %c0_i32_0 : i32, i32
  }
  func.func @transform_4(%arg0: i32) -> (i32, i32) {
    %c0_i32 = arith.constant 0 : i32
    %c0_i32_0 = arith.constant 0 : i32
    return %arg0, %c0_i32 : i32, i32
  }
}

</mosaic_0001>

<bundles_post_ra>
// kernel: tpu_custom_call.1
= control target key start
LH: loop header
LB: loop body
LE: loop exit
PB: predicated region body
PF: predicated region fallthrough
CT: control target
= control target key end

     0   :  { %9 = vsyncpa [#allocation3], 0  ;;  %s1732_s0 = inlined_call_operand.vmem [shape: f32[200,16], index: 0, kind: input, shape index: {}]   ;;  %s1733_s1 = inlined_call_operand.vmem [shape: f32[16,128], index: 1, kind: input, shape index: {}]   ;;  %s1734_s2 = inlined_call_operand.hbm [shape: f32[2,128,128], index: 2, kind: input, shape index: {}]   ;;  %s1735_s3 = inlined_call_operand.vmem [shape: f32[3,128], index: 3, kind: input, shape index: {}]   ;;  %s1736_s4 = inlined_call_operand.hbm [shape: f32[200,128], index: 4, kind: output, shape index: {}]  }
   0x1   :  { %10 = vsyncpa [#allocation4], 0  ;;  %s19_s17 = sshll.u32 %s1734_s2, 4  ;;  %s1309_s18 = smov [#allocation2]   ;;  %s20_s17 = int_to_ptr.hbm [resolvable:$true] %s19_s17 }
   0x2   :  { %s21_s19 = sshll.u32 %s1309_s18, 4  ;;  %s1310_s20 = smov 128   ;;  %s22_s19 = int_to_ptr.vmem [resolvable:$true] %s21_s19 }
   0x3   :  { %s1311_s21 = smov 8  }
   0x4   :  { %27 = dma.hbm_to_vmem [thread:$0]  %s20_s17, 4096, %s22_s19, [#allocation3], %s1310_s20, %s1310_s20, %s1311_s21  }
   0x5   :  { %1305 = dma.done.wait [#allocation3], 4096  }
   0x6   :  { %1306 = vsyncadd [#allocation3], 4294963200  ;;  %v61_v0 = vld [vmem:[%s1733_s1 + $0x8] sm:$0xff]  ;;  %v60_v1 = vld [vmem:[%s1733_s1] sm:$0xff]  ;;  %vm63_vm0 = vcmask 130048   ;;  %s1081_s27 = sshll.u32 %s1736_s4, 4  ;;  %s1082_s27 = int_to_ptr.hbm [resolvable:$true] %s1081_s27 }
   0x7   :  { %153 = vmatpush.msra.mxu0 %v61_v0  ;;  %v34_v2 = vld [vmem:[%s1732_s0] sm:$0xff]  ;;  %1119 = vmatpush.msra.mxu3 %v61_v0  ;;  %v35_v3 = vld [vmem:[%s1732_s0 + $0x8] sm:$0xff]  ;;  %v36_v4 = vld [vmem:[%s1732_s0 + $0x10] sm:$0xff] }
   0x8   :  { %v37_v5 = vld [vmem:[%s1732_s0 + $0x18] sm:$0xff]  ;;  %v38_v6 = vld [vmem:[%s1732_s0 + $0x20] sm:$0xff]  ;;  %v39_v7 = vld [vmem:[%s1732_s0 + $0x28] sm:$0xff] }
   0x9   :  { %154 = vmatpush.msra.mxu0 %v60_v1  ;;  %1120 = vmatpush.msra.mxu3 %v60_v1  ;;  %v40_v8 = vld [vmem:[%s1732_s0 + $0x30] sm:$0xff]  ;;  %v41_v9 = vld [vmem:[%s1732_s0 + $0x38] sm:$0xff]  ;;  %v42_v10 = vld [vmem:[%s1732_s0 + $0x40] sm:$0xff] }
   0xa   :  { %1094 = vmatmul.msk.f32.vlgmr.msra.gmra.mxu0 %vm63_vm0, %v34_v2  ;;  %v271_v11 = vld [vmem:[#allocation2 + $0x78] sm:$0xff]  ;;  %v270_v12 = vld [vmem:[#allocation2 + $0x70] sm:$0xff]  ;;  %v269_v13 = vld [vmem:[#allocation2 + $0x68] sm:$0xff] }
   0xb   :  { %273 = vmatpush.msra.mxu1 %v271_v11  ;;  %1121 = vmatpush.msrb.mxu3 %v271_v11  ;;  %v43_v14 = vld [vmem:[%s1732_s0 + $0x48] sm:$0xff]  ;;  %v268_v15 = vld [vmem:[#allocation2 + $0x60] sm:$0xff]  ;;  %v267_v16 = vld [vmem:[#allocation2 + $0x58] sm:$0xff] }
   0xc   :  { %v266_v17 = vld [vmem:[#allocation2 + $0x50] sm:$0xff]  ;;  %v265_v18 = vld [vmem:[#allocation2 + $0x48] sm:$0xff]  ;;  %v264_v20 = vld [vmem:[#allocation2 + $0x40] sm:$0xff] }
   0xd   :  { %274 = vmatpush.msra.mxu1 %v270_v12  ;;  %1122 = vmatpush.msrb.mxu3 %v270_v12  ;;  %v44_v19 = vld [vmem:[%s1732_s0 + $0x50] sm:$0xff]  ;;  %v263_v21 = vld [vmem:[#allocation2 + $0x38] sm:$0xff]  ;;  %v261_v23 = vld [vmem:[#allocation2 + $0x28] sm:$0xff] }
   0xe   :  { %v262_v22 = vld [vmem:[#allocation2 + $0x30] sm:$0xff]  ;;  %v45_v24 = vld [vmem:[%s1732_s0 + $0x58] sm:$0xff]  ;;  %v260_v25 = vld [vmem:[#allocation2 + $0x20] sm:$0xff] }
   0xf   :  { %275 = vmatpush.msra.mxu1 %v269_v13  ;;  %1123 = vmatpush.msrb.mxu3 %v269_v13  ;;  %v259_v26 = vld [vmem:[#allocation2 + $0x18] sm:$0xff]  ;;  %v258_v27 = vld [vmem:[#allocation2 + $0x10] sm:$0xff]  ;;  %v46_v28 = vld [vmem:[%s1732_s0 + $0x60] sm:$0xff] }
  0x10   :  { %v257_v29 = vld [vmem:[#allocation2 + $0x8] sm:$0xff]  ;;  %v256_v30 = vld [vmem:[#allocation2] sm:$0xff]  ;;  %v48_v32 = vld [vmem:[%s1732_s0 + $0x70] sm:$0xff] }
  0x11   :  { %276 = vmatpush.msra.mxu1 %v268_v15  ;;  %1124 = vmatpush.msrb.mxu3 %v268_v15  ;;  %v47_v31 = vld [vmem:[%s1732_s0 + $0x68] sm:$0xff]  ;;  %v49_v33 = vld [vmem:[%s1732_s0 + $0x78] sm:$0xff]  ;;  %v1416_v34 = vld [vmem:[%s1735_s3] sm:$0x7] }
  0x12   :  { %1095 = vmatmul.msk.f32.gmra.mxu0 %vm63_vm0, %v35_v3  ;;  %v1420_v35 = vperm.slane %v1416_v34, 0  ;;  %v50_v37 = vld [vmem:[%s1732_s0 + $0x80] sm:$0xff]  ;;  %v55_v40 = vld [vmem:[%s1732_s0 + $0xa8] sm:$0xff]  ;;  %v56_v45 = vld [vmem:[%s1732_s0 + $0xb0] sm:$0xff] }
  0x13   :  { %277 = vmatpush.msra.mxu1 %v267_v16  ;;  %1125 = vmatpush.msrb.mxu3 %v267_v16  ;;  %v51_v42 = vld [vmem:[%s1732_s0 + $0x88] sm:$0xff]  ;;  %v52_v47 = vld [vmem:[%s1732_s0 + $0x90] sm:$0xff]  ;;  %v57_v50 = vld [vmem:[%s1732_s0 + $0xb8] sm:$0xff] }
  0x14   :  { %1115 = vmatmul.msk.f32.vlgmr.msra.gmra.mxu3 %vm63_vm0, %v55_v40  ;;  %v53_v52 = vld [vmem:[%s1732_s0 + $0x98] sm:$0xff]  ;;  %v58_v55 = vld [vmem:[%s1732_s0 + $0xc0] sm:$0xff]  ;;  %v405_v11 = vld [vmem:[#allocation2 + $0xf0] sm:$0xff] }
  0x15   :  { %278 = vmatpush.msra.mxu1 %v266_v17  ;;  %1126 = vmatpush.msrb.mxu3 %v266_v17  ;;  %v54_v57 = vld [vmem:[%s1732_s0 + $0xa0] sm:$0xff]  ;;  %v404_v13 = vld [vmem:[#allocation2 + $0xe8] sm:$0xff]  ;;  %v402_v15 = vld [vmem:[#allocation2 + $0xd8] sm:$0xff]  ;;  %s1312_s0 = smov [#allocation5]  }
  0x16   :  { %s1079_s25 = sshll.u32 %s1312_s0, 4  ;;  %s1080_s25 = int_to_ptr.vmem [resolvable:$true] %s1079_s25 }
  0x17   :  { %279 = vmatpush.msra.mxu1 %v265_v18  ;;  %1127 = vmatpush.msrb.mxu3 %v265_v18  ;;  %v401_v18 = vld [vmem:[#allocation2 + $0xd0] sm:$0xff] }
  0x19   :  { %280 = vmatpush.msra.mxu1 %v264_v20  ;;  %1128 = vmatpush.msrb.mxu3 %v264_v20  ;;  %v400_v20 = vld [vmem:[#allocation2 + $0xc8] sm:$0xff] }
  0x1a   :  { %1096 = vmatmul.msk.f32.gmra.mxu0 %vm63_vm0, %v36_v4 }
  0x1b   :  { %281 = vmatpush.msra.mxu1 %v263_v21  ;;  %1129 = vmatpush.msrb.mxu3 %v263_v21  ;;  %v399_v21 = vld [vmem:[#allocation2 + $0xc0] sm:$0xff] }
  0x1c   :  { %1116 = vmatmul.msk.f32.gmra.mxu3 %vm63_vm0, %v56_v45 }
  0x1d   :  { %282 = vmatpush.msra.mxu1 %v262_v22  ;;  %1130 = vmatpush.msrb.mxu3 %v262_v22  ;;  %v398_v22 = vld [vmem:[#allocation2 + $0xb8] sm:$0xff] }
  0x1f   :  { %283 = vmatpush.msra.mxu1 %v261_v23  ;;  %1131 = vmatpush.msrb.mxu3 %v261_v23 }
  0x21   :  { %284 = vmatpush.msra.mxu1 %v260_v25  ;;  %1132 = vmatpush.msrb.mxu3 %v260_v25  ;;  %v397_v25 = vld [vmem:[#allocation2 + $0xb0] sm:$0xff] }
  0x22   :  { %1097 = vmatmul.msk.f32.gmra.mxu0 %vm63_vm0, %v37_v5 }
  0x23   :  { %285 = vmatpush.msra.mxu1 %v259_v26  ;;  %1133 = vmatpush.msrb.mxu3 %v259_v26 }
  0x24   :  { %1117 = vmatmul.msk.f32.gmra.mxu3 %vm63_vm0, %v57_v50 }
  0x25   :  { %286 = vmatpush.msra.mxu1 %v258_v27  ;;  %1134 = vmatpush.msrb.mxu3 %v258_v27  ;;  %v396_v27 = vld [vmem:[#allocation2 + $0xa8] sm:$0xff] }
  0x27   :  { %287 = vmatpush.msra.mxu1 %v257_v29  ;;  %1135 = vmatpush.msrb.mxu3 %v257_v29  ;;  %v394_v29 = vld [vmem:[#allocation2 + $0x98] sm:$0xff] }
  0x29   :  { %288 = vmatpush.msra.mxu1 %v256_v30  ;;  %1136 = vmatpush.msrb.mxu3 %v256_v30 }
  0x2a   :  { %1098 = vmatmul.msk.f32.gmra.mxu0 %vm63_vm0, %v38_v6 }
  0x2c   :  { %1118 = vmatmul.msk.f32.gmra.mxu3 %vm63_vm0, %v58_v55 }
  0x32   :  { %1099 = vmatmul.msk.f32.gmra.mxu0 %vm63_vm0, %v39_v7 }
  0x3a   :  { %1100 = vmatmul.msk.f32.gmra.mxu0 %vm63_vm0, %v40_v8  ;;  %v406_v8 = vld [vmem:[#allocation2 + $0xf8] sm:$0xff] }
  0x3b   :  { %408 = vmatpush.msra.mxu2 %v406_v8  ;;  %1137 = vmatpush.msra.mxu3 %v406_v8 }
  0x3d   :  { %409 = vmatpush.msra.mxu2 %v405_v11  ;;  %1138 = vmatpush.msra.mxu3 %v405_v11 }
  0x3f   :  { %410 = vmatpush.msra.mxu2 %v404_v13  ;;  %1139 = vmatpush.msra.mxu3 %v404_v13 }
  0x42   :  { %1101 = vmatmul.msk.f32.gmra.mxu0 %vm63_vm0, %v41_v9 }
  0x4a   :  { %1102 = vmatmul.msk.f32.gmra.mxu0 %vm63_vm0, %v42_v10 }
  0x52   :  { %1103 = vmatmul.msk.f32.gmra.mxu0 %vm63_vm0, %v43_v14  ;;  %v403_v14 = vld [vmem:[#allocation2 + $0xe0] sm:$0xff] }
  0x53   :  { %411 = vmatpush.msra.mxu2 %v403_v14  ;;  %1140 = vmatpush.msra.mxu3 %v403_v14 }
  0x55   :  { %412 = vmatpush.msra.mxu2 %v402_v15  ;;  %1141 = vmatpush.msra.mxu3 %v402_v15 }
  0x57   :  { %413 = vmatpush.msra.mxu2 %v401_v18  ;;  %1142 = vmatpush.msra.mxu3 %v401_v18 }
  0x59   :  { %414 = vmatpush.msra.mxu2 %v400_v20  ;;  %1143 = vmatpush.msra.mxu3 %v400_v20 }
  0x5a   :  { %1104 = vmatmul.msk.f32.gmra.mxu0 %vm63_vm0, %v44_v19 }
  0x5b   :  { %415 = vmatpush.msra.mxu2 %v399_v21  ;;  %1144 = vmatpush.msra.mxu3 %v399_v21 }
  0x5d   :  { %416 = vmatpush.msra.mxu2 %v398_v22  ;;  %1145 = vmatpush.msra.mxu3 %v398_v22 }
  0x5f   :  { %417 = vmatpush.msra.mxu2 %v397_v25  ;;  %1146 = vmatpush.msra.mxu3 %v397_v25 }
  0x61   :  { %418 = vmatpush.msra.mxu2 %v396_v27  ;;  %1147 = vmatpush.msra.mxu3 %v396_v27 }
  0x62   :  { %1105 = vmatmul.msk.f32.gmra.mxu0 %vm63_vm0, %v45_v24 }
  0x6a   :  { %1106 = vmatmul.msk.f32.gmra.mxu0 %vm63_vm0, %v46_v28  ;;  %v395_v28 = vld [vmem:[#allocation2 + $0xa0] sm:$0xff] }
  0x6b   :  { %419 = vmatpush.msra.mxu2 %v395_v28  ;;  %1148 = vmatpush.msra.mxu3 %v395_v28 }
  0x6d   :  { %420 = vmatpush.msra.mxu2 %v394_v29  ;;  %1149 = vmatpush.msra.mxu3 %v394_v29 }
  0x72   :  { %1107 = vmatmul.msk.f32.gmra.mxu0 %vm63_vm0, %v47_v31 }
  0x7a   :  { %1108 = vmatmul.msk.f32.gmra.mxu0 %vm63_vm0, %v48_v32  ;;  %v393_v32 = vld [vmem:[#allocation2 + $0x90] sm:$0xff] }
  0x7b   :  { %421 = vmatpush.msra.mxu2 %v393_v32  ;;  %1150 = vmatpush.msra.mxu3 %v393_v32 }
  0x82   :  { %1109 = vmatmul.msk.f32.gmra.mxu0 %vm63_vm0, %v49_v33 }
  0x87   :  { %v156_v36 = vpop.f32.mrf.mxu0 }
  0x88   :  { %v157_v38 = vadd.f32 %v156_v36, %v1420_v35  ;;  %v392_v36 = vld [vmem:[#allocation2 + $0x88] sm:$0xff] }
  0x89   :  { %422 = vmatpush.msra.mxu2 %v392_v36  ;;  %1151 = vmatpush.msra.mxu3 %v392_v36 }
  0x8a   :  { %v231_v39 = vmax.f32 %v157_v38, 0.0  ;;  %1110 = vmatmul.msk.f32.gmra.mxu0 %vm63_vm0, %v50_v37  ;;  %v391_v37 = vld [vmem:[#allocation2 + $0x80] sm:$0xff] }
  0x8b   :  { %423 = vmatpush.msra.mxu2 %v391_v37  ;;  %1152 = vmatpush.msra.mxu3 %v391_v37 }
  0x8c   :  { %289 = vmatmul.f32.vlgmr.msra.gmra.mxu1 %v231_v39 }
  0x8f   :  { %v159_v41 = vpop.f32.mrf.mxu0 }
  0x90   :  { %v160_v43 = vadd.f32 %v159_v41, %v1420_v35 }
  0x92   :  { %v232_v44 = vmax.f32 %v160_v43, 0.0  ;;  %1111 = vmatmul.msk.f32.gmra.mxu0 %vm63_vm0, %v51_v42 }
  0x94   :  { %292 = vmatmul.f32.gmra.mxu1 %v232_v44 }
  0x97   :  { %v162_v46 = vpop.f32.mrf.mxu0 }
  0x98   :  { %v163_v48 = vadd.f32 %v162_v46, %v1420_v35 }
  0x9a   :  { %v233_v49 = vmax.f32 %v163_v48, 0.0  ;;  %1112 = vmatmul.msk.f32.gmra.mxu0 %vm63_vm0, %v52_v47  ;;  %v1475_v47 = vperm.slane %v1416_v34, 1 }
  0x9c   :  { %295 = vmatmul.f32.gmra.mxu1 %v233_v49 }
  0x9f   :  { %v165_v51 = vpop.f32.mrf.mxu0 }
  0xa0   :  { %v166_v53 = vadd.f32 %v165_v51, %v1420_v35 }
  0xa2   :  { %v234_v54 = vmax.f32 %v166_v53, 0.0  ;;  %1113 = vmatmul.msk.f32.gmra.mxu0 %vm63_vm0, %v53_v52 }
  0xa4   :  { %298 = vmatmul.f32.gmra.mxu1 %v234_v54 }
  0xa7   :  { %v168_v56 = vpop.f32.mrf.mxu0 }
  0xa8   :  { %v169_v58 = vadd.f32 %v168_v56, %v1420_v35 }
  0xaa   :  { %v235_v59 = vmax.f32 %v169_v58, 0.0  ;;  %1114 = vmatmul.msk.f32.gmra.mxu0 %vm63_vm0, %v54_v57 }
  0xac   :  { %301 = vmatmul.f32.gmra.mxu1 %v235_v59 }
  0xaf   :  { %v171_v60 = vpop.f32.mrf.mxu0 }
  0xb0   :  { %v172_v61 = vadd.f32 %v171_v60, %v1420_v35 }
  0xb2   :  { %v236_v62 = vmax.f32 %v172_v61, 0.0 }
  0xb4   :  { %304 = vmatmul.f32.gmra.mxu1 %v236_v62 }
  0xb7   :  { %v174_v63 = vpop.f32.mrf.mxu0 }
  0xb8   :  { %v175_v0 = vadd.f32 %v174_v63, %v1420_v35 }
  0xba   :  { %v237_v1 = vmax.f32 %v175_v0, 0.0 }
  0xbc   :  { %307 = vmatmul.f32.gmra.mxu1 %v237_v1 }
  0xbf   :  { %v177_v2 = vpop.f32.mrf.mxu0 }
  0xc0   :  { %v178_v3 = vadd.f32 %v177_v2, %v1420_v35 }
  0xc2   :  { %v238_v4 = vmax.f32 %v178_v3, 0.0 }
  0xc4   :  { %310 = vmatmul.f32.gmra.mxu1 %v238_v4 }
  0xc7   :  { %v180_v5 = vpop.f32.mrf.mxu0 }
  0xc8   :  { %v181_v6 = vadd.f32 %v180_v5, %v1420_v35 }
  0xca   :  { %v239_v7 = vmax.f32 %v181_v6, 0.0 }
  0xcc   :  { %313 = vmatmul.f32.gmra.mxu1 %v239_v7  ;;  %v219_v7 = vpop.f32.mrf.mxu3 }
  0xcd   :  { %v220_v15 = vadd.f32 %v219_v7, %v1420_v35 }
  0xcf   :  { %v183_v9 = vpop.f32.mrf.mxu0 }
  0xd0   :  { %v184_v10 = vadd.f32 %v183_v9, %v1420_v35 }
  0xd2   :  { %v240_v12 = vmax.f32 %v184_v10, 0.0 }
  0xd4   :  { %316 = vmatmul.f32.gmra.mxu1 %v240_v12 }
  0xd7   :  { %v186_v16 = vpop.f32.mrf.mxu0 }
  0xd8   :  { %v187_v17 = vadd.f32 %v186_v16, %v1420_v35  ;;  %v222_v16 = vpop.f32.mrf.mxu3 }
  0xd9   :  { %v223_v21 = vadd.f32 %v222_v16, %v1420_v35 }
  0xda   :  { %v241_v19 = vmax.f32 %v187_v17, 0.0  ;;  %v252_v17 = vmax.f32 %v220_v15, 0.0 }
  0xdc   :  { %319 = vmatmul.f32.gmra.mxu1 %v241_v19 }
  0xdf   :  { %v189_v23 = vpop.f32.mrf.mxu0 }
  0xe0   :  { %v190_v24 = vadd.f32 %v189_v23, %v1420_v35  ;;  %v225_v22 = vpop.f32.mrf.mxu3  ;;  %v253_v23 = vmax.f32 %v223_v21, 0.0 }
  0xe1   :  { %v226_v27 = vadd.f32 %v225_v22, %v1420_v35 }
  0xe2   :  { %v242_v26 = vmax.f32 %v190_v24, 0.0 }
  0xe3   :  { %v254_v28 = vmax.f32 %v226_v27, 0.0 }
  0xe4   :  { %322 = vmatmul.f32.gmra.mxu1 %v242_v26 }
  0xe7   :  { %v192_v30 = vpop.f32.mrf.mxu0 }
  0xe8   :  { %v193_v31 = vadd.f32 %v192_v30, %v1420_v35  ;;  %v228_v30 = vpop.f32.mrf.mxu3 }
  0xea   :  { %v243_v33 = vmax.f32 %v193_v31, 0.0 }
  0xec   :  { %325 = vmatmul.f32.gmra.mxu1 %v243_v33  ;;  %v229_v33 = vadd.f32 %v228_v30, %v1420_v35 }
  0xee   :  { %v255_v36 = vmax.f32 %v229_v33, 0.0 }
  0xef   :  { %v195_v38 = vpop.f32.mrf.mxu0 }
  0xf0   :  { %v196_v39 = vadd.f32 %v195_v38, %v1420_v35 }
  0xf2   :  { %v244_v40 = vmax.f32 %v196_v39, 0.0 }
  0xf4   :  { %328 = vmatmul.f32.gmra.mxu1 %v244_v40 }
  0xf7   :  { %v198_v41 = vpop.f32.mrf.mxu0 }
  0xf8   :  { %v199_v42 = vadd.f32 %v198_v41, %v1420_v35 }
  0xfa   :  { %v245_v43 = vmax.f32 %v199_v42, 0.0 }
  0xfc   :  { %331 = vmatmul.f32.gmra.mxu1 %v245_v43 }
  0xff   :  { %v201_v44 = vpop.f32.mrf.mxu0 }
 0x100   :  { %v202_v45 = vadd.f32 %v201_v44, %v1420_v35 }
 0x102   :  { %v246_v46 = vmax.f32 %v202_v45, 0.0 }
 0x104   :  { %334 = vmatmul.f32.gmra.mxu1 %v246_v46 }
 0x107   :  { %v204_v48 = vpop.f32.mrf.mxu0 }
 0x108   :  { %v205_v49 = vadd.f32 %v204_v48, %v1420_v35 }
 0x109   :  { %v290_v50 = vpop.f32.mrf.mxu1 }
 0x10a   :  { %v247_v51 = vmax.f32 %v205_v49, 0.0  ;;  %v291_v52 = vadd.f32 %v290_v50, %v1475_v47 }
 0x10c   :  { %v365_v53 = vmax.f32 %v291_v52, 0.0  ;;  %337 = vmatmul.f32.gmra.mxu1 %v247_v51 }
 0x10e   :  { %424 = vmatmul.f32.vlgmr.msra.gmra.mxu2 %v365_v53 }
 0x10f   :  { %v207_v54 = vpop.f32.mrf.mxu0 }
 0x110   :  { %v208_v55 = vadd.f32 %v207_v54, %v1420_v35 }
 0x111   :  { %v293_v56 = vpop.f32.mrf.mxu1 }
 0x112   :  { %v248_v57 = vmax.f32 %v208_v55, 0.0  ;;  %v294_v58 = vadd.f32 %v293_v56, %v1475_v47 }
 0x114   :  { %v366_v59 = vmax.f32 %v294_v58, 0.0  ;;  %340 = vmatmul.f32.gmra.mxu1 %v248_v57 }
 0x116   :  { %427 = vmatmul.f32.gmra.mxu2 %v366_v59 }
 0x117   :  { %v210_v60 = vpop.f32.mrf.mxu0 }
 0x118   :  { %v211_v61 = vadd.f32 %v210_v60, %v1420_v35 }
 0x119   :  { %v296_v62 = vpop.f32.mrf.mxu1 }
 0x11a   :  { %v249_v63 = vmax.f32 %v211_v61, 0.0  ;;  %v297_v0 = vadd.f32 %v296_v62, %v1475_v47 }
 0x11c   :  { %v367_v1 = vmax.f32 %v297_v0, 0.0  ;;  %343 = vmatmul.f32.vlgmr.msrb.gmra.mxu3 %v249_v63  ;;  %v1504_v0 = vperm.slane %v1416_v34, 2 }
 0x11e   :  { %430 = vmatmul.f32.gmra.mxu2 %v367_v1 }
 0x11f   :  { %v213_v2 = vpop.f32.mrf.mxu0 }
 0x120   :  { %v214_v3 = vadd.f32 %v213_v2, %v1420_v35 }
 0x121   :  { %v299_v4 = vpop.f32.mrf.mxu1 }
 0x122   :  { %v250_v5 = vmax.f32 %v214_v3, 0.0  ;;  %v300_v6 = vadd.f32 %v299_v4, %v1475_v47 }
 0x124   :  { %v368_v8 = vmax.f32 %v300_v6, 0.0  ;;  %346 = vmatmul.f32.gmra.mxu3 %v250_v5 }
 0x126   :  { %433 = vmatmul.f32.gmra.mxu2 %v368_v8 }
 0x127   :  { %v216_v9 = vpop.f32.mrf.mxu0 }
 0x128   :  { %v217_v10 = vadd.f32 %v216_v9, %v1420_v35 }
 0x129   :  { %v302_v11 = vpop.f32.mrf.mxu1 }
 0x12a   :  { %v251_v12 = vmax.f32 %v217_v10, 0.0  ;;  %v303_v13 = vadd.f32 %v302_v11, %v1475_v47 }
 0x12c   :  { %v369_v14 = vmax.f32 %v303_v13, 0.0  ;;  %349 = vmatmul.f32.gmra.mxu3 %v251_v12 }
 0x12e   :  { %436 = vmatmul.f32.gmra.mxu2 %v369_v14 }
 0x131   :  { %v305_v18 = vpop.f32.mrf.mxu1 }
 0x132   :  { %v306_v19 = vadd.f32 %v305_v18, %v1475_v47 }
 0x134   :  { %v370_v20 = vmax.f32 %v306_v19, 0.0  ;;  %352 = vmatmul.f32.gmra.mxu3 %v252_v17 }
 0x136   :  { %439 = vmatmul.f32.gmra.mxu2 %v370_v20 }
 0x139   :  { %v308_v24 = vpop.f32.mrf.mxu1 }
 0x13a   :  { %v309_v25 = vadd.f32 %v308_v24, %v1475_v47 }
 0x13c   :  { %v371_v26 = vmax.f32 %v309_v25, 0.0  ;;  %355 = vmatmul.f32.gmra.mxu3 %v253_v23 }
 0x13e   :  { %442 = vmatmul.f32.gmra.mxu2 %v371_v26 }
 0x141   :  { %v311_v29 = vpop.f32.mrf.mxu1 }
 0x142   :  { %v312_v31 = vadd.f32 %v311_v29, %v1475_v47 }
 0x144   :  { %v372_v32 = vmax.f32 %v312_v31, 0.0  ;;  %358 = vmatmul.f32.gmra.mxu3 %v254_v28 }
 0x146   :  { %445 = vmatmul.f32.gmra.mxu2 %v372_v32 }
 0x149   :  { %v314_v37 = vpop.f32.mrf.mxu1 }
 0x14a   :  { %v315_v38 = vadd.f32 %v314_v37, %v1475_v47 }
 0x14c   :  { %v373_v39 = vmax.f32 %v315_v38, 0.0  ;;  %361 = vmatmul.f32.gmra.mxu3 %v255_v36 }
 0x14e   :  { %448 = vmatmul.f32.gmra.mxu2 %v373_v39 }
 0x151   :  { %v317_v40 = vpop.f32.mrf.mxu1 }
 0x152   :  { %v318_v41 = vadd.f32 %v317_v40, %v1475_v47 }
 0x154   :  { %v374_v42 = vmax.f32 %v318_v41, 0.0 }
 0x156   :  { %451 = vmatmul.f32.gmra.mxu2 %v374_v42 }
 0x159   :  { %v320_v43 = vpop.f32.mrf.mxu1 }
 0x15a   :  { %v321_v44 = vadd.f32 %v320_v43, %v1475_v47 }
 0x15c   :  { %v375_v45 = vmax.f32 %v321_v44, 0.0 }
 0x15e   :  { %454 = vmatmul.f32.gmra.mxu2 %v375_v45 }
 0x161   :  { %v323_v46 = vpop.f32.mrf.mxu1 }
 0x162   :  { %v324_v35 = vadd.f32 %v323_v46, %v1475_v47 }
 0x164   :  { %v376_v48 = vmax.f32 %v324_v35, 0.0 }
 0x166   :  { %457 = vmatmul.f32.gmra.mxu2 %v376_v48 }
 0x169   :  { %v326_v49 = vpop.f32.mrf.mxu1 }
 0x16a   :  { %v327_v50 = vadd.f32 %v326_v49, %v1475_v47 }
 0x16c   :  { %v377_v51 = vmax.f32 %v327_v50, 0.0 }
 0x16e   :  { %460 = vmatmul.f32.gmra.mxu2 %v377_v51 }
 0x171   :  { %v329_v52 = vpop.f32.mrf.mxu1 }
 0x172   :  { %v330_v53 = vadd.f32 %v329_v52, %v1475_v47 }
 0x174   :  { %v378_v54 = vmax.f32 %v330_v53, 0.0 }
 0x176   :  { %463 = vmatmul.f32.gmra.mxu2 %v378_v54 }
 0x179   :  { %v332_v55 = vpop.f32.mrf.mxu1 }
 0x17a   :  { %v333_v56 = vadd.f32 %v332_v55, %v1475_v47 }
 0x17c   :  { %v379_v57 = vmax.f32 %v333_v56, 0.0 }
 0x17e   :  { %466 = vmatmul.f32.gmra.mxu2 %v379_v57 }
 0x181   :  { %v335_v58 = vpop.f32.mrf.mxu1 }
 0x182   :  { %v336_v59 = vadd.f32 %v335_v58, %v1475_v47 }
 0x184   :  { %v380_v60 = vmax.f32 %v336_v59, 0.0 }
 0x186   :  { %469 = vmatmul.f32.gmra.mxu2 %v380_v60 }
 0x189   :  { %v338_v61 = vpop.f32.mrf.mxu1 }
 0x18a   :  { %v339_v62 = vadd.f32 %v338_v61, %v1475_v47 }
 0x18c   :  { %v381_v63 = vmax.f32 %v339_v62, 0.0 }
 0x18e   :  { %472 = vmatmul.f32.gmra.mxu2 %v381_v63 }
 0x191   :  { %v341_v1 = vpop.f32.mrf.mxu1  ;;  %v425_v2 = vpop.f32.mrf.mxu2 }
 0x192   :  { %v342_v3 = vadd.f32 %v341_v1, %v1475_v47  ;;  %v426_v4 = vadd.f32 %v425_v2, %v1504_v0 }
 0x194   :  { %v382_v5 = vmax.f32 %v342_v3, 0.0  ;;  %v500_v6 = vand.u32 2147483647, %v426_v4  ;;  %vm600_vm3 = vcmp.ge.f32.partialorder %v426_v4, 0.0 }
 0x196   :  { %v525_v7 = vsub.f32 0.0, %v500_v6  ;;  %475 = vmatmul.f32.gmra.mxu2 %v382_v5 }
 0x198   :  { %v550_v8 = vmul.f32 1.442695, %v525_v7 }
 0x199   :  { %v428_v9 = vpop.f32.mrf.mxu2 }
 0x19a   :  { %1157 = vpow2.f32 %v550_v8  ;;  %v1509_v10 = vadd.f32 %v428_v9, %v1504_v0 }
 0x19c   :  { %v501_v11 = vand.u32 2147483647, %v1509_v10  ;;  %vm601_vm8 = vcmp.ge.f32.partialorder %v1509_v10, 0.0 }
 0x19e   :  { %v526_v34 = vsub.f32 0.0, %v501_v11 }
 0x19f   :  { %v344_v12 = vpop.f32.mrf.mxu3 }
 0x1a0   :  { %v1158_v13 = vpop.eup %1157  ;;  %v552_v14 = vmul.f32 1.442695, %v526_v34  ;;  %v345_v15 = vadd.f32 %v344_v12, %v1475_v47 }
 0x1a1   :  { %v650_v16 = vadd.f32 1.0, %v1158_v13  ;;  %v431_v17 = vpop.f32.mrf.mxu2  ;;  %v625_v51 = vsel %vm600_vm3, 1.0, %v1158_v13 }
 0x1a2   :  { %1159 = vpow2.f32 %v552_v14  ;;  %v383_v18 = vmax.f32 %v345_v15, 0.0  ;;  %v1514_v19 = vadd.f32 %v431_v17, %v1504_v0 }
 0x1a3   :  { %1161 = vrcp.f32 %v650_v16  ;;  %v686_v33 = vand.u32 2147483648, %v650_v16  ;;  %v684_v37 = vand.u32 2147483647, %v650_v16  ;;  %vm680_vm2 = vweird.f32 %v650_v16 }
 0x1a4   :  { %v502_v20 = vand.u32 2147483647, %v1514_v19  ;;  %478 = vmatmul.f32.vlgmr.msra.gmra.mxu3 %v383_v18  ;;  %vm602_vm13 = vcmp.ge.f32.partialorder %v1514_v19, 0.0 }
 0x1a5   :  { %v687_v44 = vor.u32 1.1754944e-38, %v686_v33  ;;  %vm685_vm5 = vcmp.eq.f32.partialorder %v684_v37, 8.507059e+37 }
 0x1a6   :  { %v527_v21 = vsub.f32 0.0, %v502_v20 }
 0x1a7   :  { %v347_v22 = vpop.f32.mrf.mxu3 }
 0x1a8   :  { %v1160_v23 = vpop.eup %1159  ;;  %v554_v24 = vmul.f32 1.442695, %v527_v21  ;;  %v348_v25 = vadd.f32 %v347_v22, %v1475_v47 }
 0x1a9   :  { %v1162_v26 = vpop.eup %1161  ;;  %v651_v27 = vadd.f32 1.0, %v1160_v23  ;;  %v434_v28 = vpop.f32.mrf.mxu2  ;;  %v626_v6 = vsel %vm601_vm8, 1.0, %v1160_v23 }
 0x1aa   :  { %v676_v29 = vmul.f32 %v1162_v26, %v650_v16  ;;  %1163 = vpow2.f32 %v554_v24  ;;  %v384_v30 = vmax.f32 %v348_v25, 0.0  ;;  %v1519_v32 = vadd.f32 %v434_v28, %v1504_v0 }
 0x1ab   :  { %1165 = vrcp.f32 %v651_v27  ;;  %vm681_vm1 = vweird.f32 %v1162_v26  ;;  %v701_v55 = vand.u32 2147483648, %v651_v27  ;;  %v699_v59 = vand.u32 2147483647, %v651_v27 }
 0x1ac   :  { %v677_v31 = vsub.f32 1.0, %v676_v29  ;;  %481 = vmatmul.f32.gmra.mxu3 %v384_v30  ;;  %v503_v38 = vand.u32 2147483647, %v1519_v32  ;;  %vm682_vm4 = vmor %vm680_vm2, %vm681_vm1  ;;  %vm695_vm7 = vweird.f32 %v651_v27  ;;  %vm603_vm2 = vcmp.ge.f32.partialorder %v1519_v32, 0.0 }
 0x1ad   :  { %v702_v2 = vor.u32 1.1754944e-38, %v701_v55  ;;  %vm700_vm10 = vcmp.eq.f32.partialorder %v699_v59, 8.507059e+37 }
 0x1ae   :  { %v678_v36 = vmul.f32 %v1162_v26, %v677_v31  ;;  %v528_v42 = vsub.f32 0.0, %v503_v38 }
 0x1af   :  { %v350_v39 = vpop.f32.mrf.mxu3 }
 0x1b0   :  { %v1522_v40 = vpop.eup %1163  ;;  %v679_v41 = vadd.f32 %v1162_v26, %v678_v36  ;;  %v351_v46 = vadd.f32 %v350_v39, %v1475_v47  ;;  %v556_v50 = vmul.f32 1.442695, %v528_v42 }
 0x1b1   :  { %v1166_v43 = vpop.eup %1165  ;;  %v1525_v45 = vadd.f32 1.0, %v1522_v40  ;;  %v437_v35 = vpop.f32.mrf.mxu2  ;;  %v627_v30 = vsel %vm602_vm13, 1.0, %v1522_v40 }
 0x1b2   :  { %v683_v48 = vsel %vm682_vm4, %v1162_v26, %v679_v41  ;;  %v691_v49 = vmul.f32 %v1166_v43, %v651_v27  ;;  %v385_v56 = vmax.f32 %v351_v46, 0.0  ;;  %v1530_v57 = vadd.f32 %v437_v35, %v1504_v0 }
 0x1b3   :  { %v688_v52 = vsel %vm685_vm5, %v687_v44, %v683_v48  ;;  %1167 = vrcp.f32 %v1525_v45  ;;  %vm696_vm6 = vweird.f32 %v1166_v43  ;;  %v714_v15 = vand.u32 2147483647, %v1525_v45 }
 0x1b4   :  { %v689_v53 = vmul.f32 %v688_v52, %v625_v51  ;;  %v692_v54 = vsub.f32 1.0, %v691_v49  ;;  %1169 = vpow2.f32 %v556_v50  ;;  %v504_v60 = vand.u32 2147483647, %v1530_v57  ;;  %484 = vmatmul.f32.gmra.mxu3 %v385_v56  ;;  %vm697_vm9 = vmor %vm695_vm7, %vm696_vm6 }
 0x1b5   :  { %v716_v16 = vand.u32 2147483648, %v1525_v45  ;;  %vm710_vm12 = vweird.f32 %v1525_v45  ;;  %vm715_vm15 = vcmp.eq.f32.partialorder %v714_v15, 8.507059e+37  ;;  %vm604_vm7 = vcmp.ge.f32.partialorder %v1530_v57, 0.0 }
 0x1b6   :  { %1050 = vst [vmem:[#allocation5] sm:$0xff] %v689_v53  ;;  %v693_v58 = vmul.f32 %v1166_v43, %v692_v54  ;;  %v529_v3 = vsub.f32 0.0, %v504_v60 }
 0x1b7   :  { %v353_v61 = vpop.f32.mrf.mxu3  ;;  %v717_v24 = vor.u32 1.1754944e-38, %v716_v16 }
 0x1b8   :  { %v694_v62 = vadd.f32 %v1166_v43, %v693_v58  ;;  %v354_v63 = vadd.f32 %v353_v61, %v1475_v47  ;;  %v558_v34 = vmul.f32 1.442695, %v529_v3 }
 0x1b9   :  { %v1168_v1 = vpop.eup %1167  ;;  %v440_v4 = vpop.f32.mrf.mxu2 }
 0x1ba   :  { %v1535_v5 = vpop.eup %1169  ;;  %v698_v7 = vsel %vm697_vm9, %v1166_v43, %v694_v62  ;;  %v706_v8 = vmul.f32 %v1168_v1, %v1525_v45  ;;  %v386_v12 = vmax.f32 %v354_v63, 0.0  ;;  %v1540_v10 = vadd.f32 %v440_v4, %v1504_v0 }
 0x1bb   :  { %v703_v9 = vsel %vm700_vm10, %v702_v2, %v698_v7  ;;  %v653_v11 = vadd.f32 1.0, %v1535_v5  ;;  %vm711_vm11 = vweird.f32 %v1168_v1  ;;  %v628_v59 = vsel %vm603_vm2, 1.0, %v1535_v5 }
 0x1bc   :  { %v704_v13 = vmul.f32 %v703_v9, %v626_v6  ;;  %v707_v14 = vsub.f32 1.0, %v706_v8  ;;  %v505_v18 = vand.u32 2147483647, %v1540_v10  ;;  %487 = vmatmul.f32.gmra.mxu3 %v386_v12  ;;  %vm712_vm14 = vmor %vm710_vm12, %vm711_vm11  ;;  %vm605_vm12 = vcmp.ge.f32.partialorder %v1540_v10, 0.0 }
 0x1bd   :  { %1171 = vrcp.f32 %v653_v11  ;;  %v729_v42 = vand.u32 2147483647, %v653_v11  ;;  %v731_v43 = vand.u32 2147483648, %v653_v11  ;;  %vm725_vm1 = vweird.f32 %v653_v11 }
 0x1be   :  { %1051 = vst [vmem:[#allocation5 + $0x8] sm:$0xff] %v704_v13  ;;  %v708_v17 = vmul.f32 %v1168_v1, %v707_v14  ;;  %1173 = vpow2.f32 %v558_v34  ;;  %v530_v22 = vsub.f32 0.0, %v505_v18 }
 0x1bf   :  { %v356_v20 = vpop.f32.mrf.mxu3  ;;  %v732_v52 = vor.u32 1.1754944e-38, %v731_v43  ;;  %vm730_vm4 = vcmp.eq.f32.partialorder %v729_v42, 8.507059e+37 }
 0x1c0   :  { %v709_v21 = vadd.f32 %v1168_v1, %v708_v17  ;;  %v357_v23 = vadd.f32 %v356_v20, %v1475_v47  ;;  %v560_v27 = vmul.f32 1.442695, %v530_v22 }
 0x1c1   :  { %v443_v25 = vpop.f32.mrf.mxu2 }
 0x1c2   :  { %v713_v26 = vsel %vm712_vm14, %v1168_v1, %v709_v21  ;;  %v1549_v28 = vadd.f32 %v443_v25, %v1504_v0  ;;  %v387_v33 = vmax.f32 %v357_v23, 0.0  ;;  %1175 = vpow2.f32 %v560_v27 }
 0x1c3   :  { %v1172_v29 = vpop.eup %1171  ;;  %v718_v31 = vsel %vm715_vm15, %v717_v24, %v713_v26 }
 0x1c4   :  { %v1552_v36 = vpop.eup %1173  ;;  %v719_v37 = vmul.f32 %v718_v31, %v627_v30  ;;  %v721_v38 = vmul.f32 %v1172_v29, %v653_v11  ;;  %v506_v39 = vand.u32 2147483647, %v1549_v28  ;;  %490 = vmatmul.f32.gmra.mxu3 %v387_v33  ;;  %vm726_vm0 = vweird.f32 %v1172_v29 }
 0x1c5   :  { %v654_v19 = vadd.f32 1.0, %v1552_v36  ;;  %vm727_vm3 = vmor %vm725_vm1, %vm726_vm0  ;;  %v629_v20 = vsel %vm604_vm7, 1.0, %v1552_v36  ;;  %vm606_vm2 = vcmp.ge.f32.partialorder %v1549_v28, 0.0 }
 0x1c6   :  { %1052 = vst [vmem:[#allocation5 + $0x10] sm:$0xff] %v719_v37  ;;  %v722_v41 = vsub.f32 1.0, %v721_v38  ;;  %v531_v40 = vsub.f32 0.0, %v506_v39 }
 0x1c7   :  { %1177 = vrcp.f32 %v654_v19  ;;  %v359_v44 = vpop.f32.mrf.mxu3  ;;  %v746_v3 = vand.u32 2147483648, %v654_v19  ;;  %v744_v5 = vand.u32 2147483647, %v654_v19  ;;  %vm740_vm6 = vweird.f32 %v654_v19 }
 0x1c8   :  { %v723_v45 = vmul.f32 %v1172_v29, %v722_v41  ;;  %v360_v46 = vadd.f32 %v359_v44, %v1475_v47  ;;  %v1557_v48 = vpop.eup %1175  ;;  %v562_v50 = vmul.f32 1.442695, %v531_v40 }
 0x1c9   :  { %v446_v35 = vpop.f32.mrf.mxu2  ;;  %v1564_v53 = vadd.f32 1.0, %v1557_v48  ;;  %v747_v15 = vor.u32 1.1754944e-38, %v746_v3  ;;  %vm745_vm9 = vcmp.eq.f32.partialorder %v744_v5, 8.507059e+37 }
 0x1ca   :  { %v724_v49 = vadd.f32 %v1172_v29, %v723_v45  ;;  %v1560_v51 = vadd.f32 %v446_v35, %v1504_v0  ;;  %v388_v54 = vmax.f32 %v360_v46, 0.0  ;;  %1179 = vpow2.f32 %v562_v50 }
 0x1cb   :  { %1181 = vrcp.f32 %v1564_v53  ;;  %v759_v22 = vand.u32 2147483647, %v1564_v53  ;;  %v761_v23 = vand.u32 2147483648, %v1564_v53  ;;  %vm755_vm11 = vweird.f32 %v1564_v53 }
 0x1cc   :  { %v728_v55 = vsel %vm727_vm3, %v1172_v29, %v724_v49  ;;  %v507_v56 = vand.u32 2147483647, %v1560_v51  ;;  %493 = vmatmul.f32.gmra.mxu3 %v388_v54 }
 0x1cd   :  { %v1178_v58 = vpop.eup %1177  ;;  %v733_v60 = vsel %vm730_vm4, %v732_v52, %v728_v55  ;;  %v762_v33 = vor.u32 1.1754944e-38, %v761_v23  ;;  %vm760_vm14 = vcmp.eq.f32.partialorder %v759_v22, 8.507059e+37 }
 0x1ce   :  { %v734_v61 = vmul.f32 %v733_v60, %v628_v59  ;;  %v736_v62 = vmul.f32 %v1178_v58, %v654_v19  ;;  %v532_v32 = vsub.f32 0.0, %v507_v56  ;;  %vm741_vm5 = vweird.f32 %v1178_v58 }
 0x1cf   :  { %v362_v63 = vpop.f32.mrf.mxu3  ;;  %vm742_vm8 = vmor %vm740_vm6, %vm741_vm5  ;;  %v630_v19 = vsel %vm605_vm12, 1.0, %v1557_v48  ;;  %vm607_vm6 = vcmp.ge.f32.partialorder %v1560_v51, 0.0 }
 0x1d0   :  { %1053 = vst [vmem:[#allocation5 + $0x18] sm:$0xff] %v734_v61  ;;  %v737_v1 = vsub.f32 1.0, %v736_v62  ;;  %v363_v2 = vadd.f32 %v362_v63, %v1475_v47  ;;  %v564_v4 = vmul.f32 1.442695, %v532_v32  ;;  %v1570_v7 = vpop.eup %1179 }
 0x1d1   :  { %v449_v6 = vpop.f32.mrf.mxu2  ;;  %v1182_v11 = vpop.eup %1181  ;;  %v1576_v34 = vadd.f32 1.0, %v1570_v7 }
 0x1d2   :  { %v738_v8 = vmul.f32 %v1178_v58, %v737_v1  ;;  %v1573_v9 = vadd.f32 %v449_v6, %v1504_v0  ;;  %1183 = vpow2.f32 %v564_v4  ;;  %v389_v12 = vmax.f32 %v363_v2, 0.0 }
 0x1d3   :  { %v751_v47 = vmul.f32 %v1182_v11, %v1564_v53  ;;  %1185 = vrcp.f32 %v1576_v34  ;;  %vm756_vm10 = vweird.f32 %v1182_v11  ;;  %v776_v44 = vand.u32 2147483648, %v1576_v34 }
 0x1d4   :  { %v739_v13 = vadd.f32 %v1178_v58, %v738_v8  ;;  %v508_v14 = vand.u32 2147483647, %v1573_v9  ;;  %496 = vmatmul.f32.gmra.mxu3 %v389_v12  ;;  %vm757_vm13 = vmor %vm755_vm11, %vm756_vm10  ;;  %v774_v40 = vand.u32 2147483647, %v1576_v34  ;;  %vm770_vm0 = vweird.f32 %v1576_v34 }
 0x1d5   :  { %v752_v17 = vsub.f32 1.0, %v751_v47  ;;  %v777_v54 = vor.u32 1.1754944e-38, %v776_v44  ;;  %vm608_vm11 = vcmp.ge.f32.partialorder %v1573_v9, 0.0 }
 0x1d6   :  { %v743_v16 = vsel %vm742_vm8, %v1178_v58, %v739_v13  ;;  %v533_v18 = vsub.f32 0.0, %v508_v14  ;;  %vm775_vm3 = vcmp.eq.f32.partialorder %v774_v40, 8.507059e+37  ;;  %v631_v58 = vsel %vm606_vm2, 1.0, %v1570_v7 }
 0x1d7   :  { %v748_v21 = vsel %vm745_vm9, %v747_v15, %v743_v16  ;;  %v753_v25 = vmul.f32 %v1182_v11, %v752_v17 }
 0x1d8   :  { %v749_v24 = vmul.f32 %v748_v21, %v629_v20  ;;  %v566_v57 = vmul.f32 1.442695, %v533_v18  ;;  %v1585_v26 = vpop.eup %1183 }
 0x1d9   :  { %v452_v27 = vpop.f32.mrf.mxu2  ;;  %v754_v29 = vadd.f32 %v1182_v11, %v753_v25  ;;  %v657_v30 = vadd.f32 1.0, %v1585_v26  ;;  %v1186_v31 = vpop.eup %1185  ;;  %v632_v13 = vsel %vm607_vm6, 1.0, %v1585_v26 }
 0x1da   :  { %1054 = vst [vmem:[#allocation5 + $0x20] sm:$0xff] %v749_v24  ;;  %1187 = vpow2.f32 %v566_v57  ;;  %v1591_v36 = vadd.f32 %v452_v27, %v1504_v0  ;;  %v766_v38 = vmul.f32 %v1186_v31, %v1576_v34  ;;  %vm771_vm15 = vweird.f32 %v1186_v31 }
 0x1db   :  { %v758_v37 = vsel %vm757_vm13, %v1182_v11, %v754_v29  ;;  %1189 = vrcp.f32 %v657_v30  ;;  %vm772_vm1 = vmor %vm770_vm0, %vm771_vm15  ;;  %v791_v32 = vand.u32 2147483648, %v657_v30  ;;  %v789_v1 = vand.u32 2147483647, %v657_v30 }
 0x1dc   :  { %v763_v39 = vsel %vm760_vm14, %v762_v33, %v758_v37  ;;  %v767_v42 = vsub.f32 1.0, %v766_v38  ;;  %v509_v43 = vand.u32 2147483647, %v1591_v36  ;;  %vm785_vm5 = vweird.f32 %v657_v30 }
 0x1dd   :  { %v764_v41 = vmul.f32 %v763_v39, %v630_v19  ;;  %v792_v7 = vor.u32 1.1754944e-38, %v791_v32  ;;  %vm790_vm8 = vcmp.eq.f32.partialorder %v789_v1, 8.507059e+37 }
 0x1de   :  { %v768_v45 = vmul.f32 %v1186_v31, %v767_v42  ;;  %v534_v46 = vsub.f32 0.0, %v509_v43 }
 0x1df   :  { %1055 = vst [vmem:[#allocation5 + $0x28] sm:$0xff] %v764_v41 }
 0x1e0   :  { %v1597_v10 = vpop.eup %1187  ;;  %v769_v50 = vadd.f32 %v1186_v31, %v768_v45  ;;  %v568_v52 = vmul.f32 1.442695, %v534_v46 }
 0x1e1   :  { %v1601_v35 = vadd.f32 1.0, %v1597_v10  ;;  %v455_v49 = vpop.f32.mrf.mxu2  ;;  %v1190_v48 = vpop.eup %1189  ;;  %v633_v29 = vsel %vm608_vm11, 1.0, %v1597_v10 }
 0x1e2   :  { %v1605_v53 = vadd.f32 %v455_v49, %v1504_v0  ;;  %v781_v55 = vmul.f32 %v1190_v48, %v657_v30  ;;  %v773_v56 = vsel %vm772_vm1, %v1186_v31, %v769_v50  ;;  %vm786_vm4 = vweird.f32 %v1190_v48 }
 0x1e3   :  { %1191 = vrcp.f32 %v1601_v35  ;;  %v778_v59 = vsel %vm775_vm3, %v777_v54, %v773_v56  ;;  %vm787_vm7 = vmor %vm785_vm5, %vm786_vm4  ;;  %v806_v51 = vand.u32 2147483648, %v1601_v35  ;;  %v804_v18 = vand.u32 2147483647, %v1601_v35 }
 0x1e4   :  { %1193 = vpow2.f32 %v568_v52  ;;  %v782_v60 = vsub.f32 1.0, %v781_v55  ;;  %v510_v61 = vand.u32 2147483647, %v1605_v53  ;;  %v779_v62 = vmul.f32 %v778_v59, %v631_v58 }
 0x1e5   :  { %vm800_vm10 = vweird.f32 %v1601_v35  ;;  %v807_v24 = vor.u32 1.1754944e-38, %v806_v51  ;;  %vm805_vm13 = vcmp.eq.f32.partialorder %v804_v18, 8.507059e+37  ;;  %vm609_vm1 = vcmp.ge.f32.partialorder %v1591_v36, 0.0 }
 0x1e6   :  { %v783_v63 = vmul.f32 %v1190_v48, %v782_v60  ;;  %v535_v2 = vsub.f32 0.0, %v510_v61  ;;  %1056 = vst [vmem:[#allocation5 + $0x30] sm:$0xff] %v779_v62  ;;  %vm610_vm5 = vcmp.ge.f32.partialorder %v1605_v53, 0.0 }
 0x1e8   :  { %v784_v4 = vadd.f32 %v1190_v48, %v783_v63  ;;  %v570_v28 = vmul.f32 1.442695, %v535_v2 }
 0x1e9   :  { %v1192_v3 = vpop.eup %1191  ;;  %v458_v6 = vpop.f32.mrf.mxu2 }
 0x1ea   :  { %v1611_v8 = vpop.eup %1193  ;;  %v796_v5 = vmul.f32 %v1192_v3, %v1601_v35  ;;  %v1616_v11 = vadd.f32 %v458_v6, %v1504_v0  ;;  %v788_v34 = vsel %vm787_vm7, %v1190_v48, %v784_v4  ;;  %1195 = vpow2.f32 %v570_v28 }
 0x1eb   :  { %v659_v12 = vadd.f32 1.0, %v1611_v8  ;;  %v793_v47 = vsel %vm790_vm8, %v792_v7, %v788_v34  ;;  %vm801_vm9 = vweird.f32 %v1192_v3  ;;  %v634_v52 = vsel %vm609_vm1, 1.0, %v1611_v8 }
 0x1ec   :  { %v797_v14 = vsub.f32 1.0, %v796_v5  ;;  %v511_v15 = vand.u32 2147483647, %v1616_v11  ;;  %v794_v16 = vmul.f32 %v793_v47, %v632_v13  ;;  %vm802_vm12 = vmor %vm800_vm10, %vm801_vm9  ;;  %vm611_vm10 = vcmp.ge.f32.partialorder %v1616_v11, 0.0 }
 0x1ed   :  { %1197 = vrcp.f32 %v659_v12  ;;  %v821_v19 = vand.u32 2147483648, %v659_v12  ;;  %v819_v43 = vand.u32 2147483647, %v659_v12  ;;  %vm815_vm15 = vweird.f32 %v659_v12 }
 0x1ee   :  { %v798_v17 = vmul.f32 %v1192_v3, %v797_v14  ;;  %v536_v20 = vsub.f32 0.0, %v511_v15  ;;  %1057 = vst [vmem:[#allocation5 + $0x38] sm:$0xff] %v794_v16 }
 0x1ef   :  { %v822_v49 = vor.u32 1.1754944e-38, %v821_v19  ;;  %vm820_vm2 = vcmp.eq.f32.partialorder %v819_v43, 8.507059e+37 }
 0x1f0   :  { %v799_v21 = vadd.f32 %v1192_v3, %v798_v17  ;;  %v572_v22 = vmul.f32 1.442695, %v536_v20  ;;  %v1624_v23 = vpop.eup %1195 }
 0x1f1   :  { %v461_v25 = vpop.f32.mrf.mxu2  ;;  %v660_v26 = vadd.f32 1.0, %v1624_v23  ;;  %v635_v7 = vsel %vm610_vm5, 1.0, %v1624_v23 }
 0x1f2   :  { %v803_v57 = vsel %vm802_vm12, %v1192_v3, %v799_v21  ;;  %1199 = vpow2.f32 %v572_v22  ;;  %v1630_v31 = vadd.f32 %v461_v25, %v1504_v0 }
 0x1f3   :  { %v1198_v27 = vpop.eup %1197  ;;  %v808_v30 = vsel %vm805_vm13, %v807_v24, %v803_v57  ;;  %1201 = vrcp.f32 %v660_v26  ;;  %v836_v59 = vand.u32 2147483648, %v660_v26  ;;  %v834_v61 = vand.u32 2147483647, %v660_v26 }
 0x1f4   :  { %v809_v33 = vmul.f32 %v808_v30, %v633_v29  ;;  %v811_v37 = vmul.f32 %v1198_v27, %v659_v12  ;;  %v512_v9 = vand.u32 2147483647, %v1630_v31  ;;  %vm816_vm14 = vweird.f32 %v1198_v27 }
 0x1f5   :  { %vm817_vm0 = vmor %vm815_vm15, %vm816_vm14  ;;  %vm830_vm4 = vweird.f32 %v660_v26  ;;  %v837_v3 = vor.u32 1.1754944e-38, %v836_v59  ;;  %vm835_vm7 = vcmp.eq.f32.partialorder %v834_v61, 8.507059e+37 }
 0x1f6   :  { %1058 = vst [vmem:[#allocation5 + $0x40] sm:$0xff] %v809_v33  ;;  %v812_v38 = vsub.f32 1.0, %v811_v37  ;;  %v537_v39 = vsub.f32 0.0, %v512_v9 }
 0x1f8   :  { %v1633_v41 = vpop.eup %1199  ;;  %v813_v42 = vmul.f32 %v1198_v27, %v812_v38  ;;  %v574_v10 = vmul.f32 1.442695, %v537_v39 }
 0x1f9   :  { %v1636_v44 = vadd.f32 1.0, %v1633_v41  ;;  %v464_v45 = vpop.f32.mrf.mxu2  ;;  %v1202_v40 = vpop.eup %1201  ;;  %v636_v24 = vsel %vm611_vm10, 1.0, %v1633_v41 }
 0x1fa   :  { %v814_v46 = vadd.f32 %v1198_v27, %v813_v42  ;;  %v1639_v35 = vadd.f32 %v464_v45, %v1504_v0  ;;  %v826_v48 = vmul.f32 %v1202_v40, %v660_v26  ;;  %vm831_vm3 = vweird.f32 %v1202_v40 }
 0x1fb   :  { %1203 = vrcp.f32 %v1636_v44  ;;  %vm832_vm6 = vmor %vm830_vm4, %vm831_vm3  ;;  %v851_v53 = vand.u32 2147483648, %v1636_v44  ;;  %v849_v14 = vand.u32 2147483647, %v1636_v44  ;;  %vm845_vm9 = vweird.f32 %v1636_v44 }
 0x1fc   :  { %v818_v50 = vsel %vm817_vm0, %v1198_v27, %v814_v46  ;;  %1205 = vpow2.f32 %v574_v10  ;;  %v827_v55 = vsub.f32 1.0, %v826_v48  ;;  %v513_v56 = vand.u32 2147483647, %v1639_v35 }
 0x1fd   :  { %v823_v54 = vsel %vm820_vm2, %v822_v49, %v818_v50  ;;  %v852_v18 = vor.u32 1.1754944e-38, %v851_v53  ;;  %vm850_vm12 = vcmp.eq.f32.partialorder %v849_v14, 8.507059e+37  ;;  %vm612_vm0 = vcmp.ge.f32.partialorder %v1630_v31, 0.0 }
 0x1fe   :  { %v824_v58 = vmul.f32 %v823_v54, %v634_v52  ;;  %v828_v60 = vmul.f32 %v1202_v40, %v827_v55  ;;  %v538_v62 = vsub.f32 0.0, %v513_v56  ;;  %vm613_vm4 = vcmp.ge.f32.partialorder %v1639_v35, 0.0 }
 0x200   :  { %1059 = vst [vmem:[#allocation5 + $0x48] sm:$0xff] %v824_v58  ;;  %v829_v63 = vadd.f32 %v1202_v40, %v828_v60  ;;  %v576_v36 = vmul.f32 1.442695, %v538_v62 }
 0x201   :  { %v1204_v32 = vpop.eup %1203  ;;  %v467_v1 = vpop.f32.mrf.mxu2 }
 0x202   :  { %v1645_v2 = vpop.eup %1205  ;;  %v841_v4 = vmul.f32 %v1204_v32, %v1636_v44  ;;  %v1650_v28 = vadd.f32 %v467_v1, %v1504_v0  ;;  %v833_v6 = vsel %vm832_vm6, %v1202_v40, %v829_v63  ;;  %1207 = vpow2.f32 %v576_v36 }
 0x203   :  { %v662_v8 = vadd.f32 1.0, %v1645_v2  ;;  %v838_v5 = vsel %vm835_vm7, %v837_v3, %v833_v6  ;;  %vm846_vm8 = vweird.f32 %v1204_v32  ;;  %v637_v46 = vsel %vm612_vm0, 1.0, %v1645_v2 }
 0x204   :  { %v842_v34 = vsub.f32 1.0, %v841_v4  ;;  %v514_v12 = vand.u32 2147483647, %v1650_v28  ;;  %v839_v13 = vmul.f32 %v838_v5, %v635_v7  ;;  %vm847_vm11 = vmor %vm845_vm9, %vm846_vm8  ;;  %vm614_vm9 = vcmp.ge.f32.partialorder %v1650_v28, 0.0 }
 0x205   :  { %1209 = vrcp.f32 %v662_v8  ;;  %v866_v30 = vand.u32 2147483648, %v662_v8  ;;  %v864_v38 = vand.u32 2147483647, %v662_v8  ;;  %vm860_vm14 = vweird.f32 %v662_v8 }
 0x206   :  { %v843_v47 = vmul.f32 %v1204_v32, %v842_v34  ;;  %v539_v15 = vsub.f32 0.0, %v514_v12  ;;  %1060 = vst [vmem:[#allocation5 + $0x50] sm:$0xff] %v839_v13 }
 0x207   :  { %v867_v10 = vor.u32 1.1754944e-38, %v866_v30  ;;  %vm865_vm1 = vcmp.eq.f32.partialorder %v864_v38, 8.507059e+37 }
 0x208   :  { %v844_v16 = vadd.f32 %v1204_v32, %v843_v47  ;;  %v578_v51 = vmul.f32 1.442695, %v539_v15  ;;  %v1658_v17 = vpop.eup %1207 }
 0x209   :  { %v470_v20 = vpop.f32.mrf.mxu2  ;;  %v663_v22 = vadd.f32 1.0, %v1658_v17  ;;  %v638_v3 = vsel %vm613_vm4, 1.0, %v1658_v17 }
 0x20a   :  { %v848_v21 = vsel %vm847_vm11, %v1204_v32, %v844_v16  ;;  %1211 = vpow2.f32 %v578_v51  ;;  %v1664_v57 = vadd.f32 %v470_v20, %v1504_v0 }
 0x20b   :  { %v1210_v23 = vpop.eup %1209  ;;  %v853_v25 = vsel %vm850_vm12, %v852_v18, %v848_v21  ;;  %1213 = vrcp.f32 %v663_v22  ;;  %v881_v54 = vand.u32 2147483648, %v663_v22  ;;  %v879_v56 = vand.u32 2147483647, %v663_v22 }
 0x20c   :  { %v854_v26 = vmul.f32 %v853_v25, %v636_v24  ;;  %v856_v27 = vmul.f32 %v1210_v23, %v662_v8  ;;  %v515_v11 = vand.u32 2147483647, %v1664_v57  ;;  %vm861_vm13 = vweird.f32 %v1210_v23 }
 0x20d   :  { %vm862_vm15 = vmor %vm860_vm14, %vm861_vm13  ;;  %vm875_vm3 = vweird.f32 %v663_v22  ;;  %v882_v32 = vor.u32 1.1754944e-38, %v881_v54  ;;  %vm880_vm6 = vcmp.eq.f32.partialorder %v879_v56, 8.507059e+37 }
 0x20e   :  { %1061 = vst [vmem:[#allocation5 + $0x58] sm:$0xff] %v854_v26  ;;  %v857_v29 = vsub.f32 1.0, %v856_v27  ;;  %v540_v33 = vsub.f32 0.0, %v515_v11 }
 0x210   :  { %v1667_v37 = vpop.eup %1211  ;;  %v858_v9 = vmul.f32 %v1210_v23, %v857_v29  ;;  %v580_v39 = vmul.f32 1.442695, %v540_v33 }
 0x211   :  { %v664_v19 = vadd.f32 1.0, %v1667_v37  ;;  %v473_v41 = vpop.f32.mrf.mxu2  ;;  %v1214_v42 = vpop.eup %1213  ;;  %v639_v17 = vsel %vm614_vm9, 1.0, %v1667_v37 }
 0x212   :  { %v859_v43 = vadd.f32 %v1210_v23, %v858_v9  ;;  %v1671_v44 = vadd.f32 %v473_v41, %v1504_v0  ;;  %v871_v45 = vmul.f32 %v1214_v42, %v663_v22  ;;  %vm876_vm2 = vweird.f32 %v1214_v42 }
 0x213   :  { %1215 = vrcp.f32 %v664_v19  ;;  %vm877_vm5 = vmor %vm875_vm3, %vm876_vm2  ;;  %v896_v5 = vand.u32 2147483648, %v664_v19  ;;  %v894_v34 = vand.u32 2147483647, %v664_v19  ;;  %vm890_vm8 = vweird.f32 %v664_v19 }
 0x214   :  { %v863_v40 = vsel %vm862_vm15, %v1210_v23, %v859_v43  ;;  %1217 = vpow2.f32 %v580_v39  ;;  %v872_v48 = vsub.f32 1.0, %v871_v45  ;;  %v516_v50 = vand.u32 2147483647, %v1671_v44 }
 0x215   :  { %v868_v49 = vsel %vm865_vm1, %v867_v10, %v863_v40  ;;  %v897_v14 = vor.u32 1.1754944e-38, %v896_v5  ;;  %vm895_vm11 = vcmp.eq.f32.partialorder %v894_v34, 8.507059e+37  ;;  %vm615_vm15 = vcmp.ge.f32.partialorder %v1664_v57, 0.0 }
 0x216   :  { %v869_v52 = vmul.f32 %v868_v49, %v637_v46  ;;  %v873_v55 = vmul.f32 %v1214_v42, %v872_v48  ;;  %v541_v58 = vsub.f32 0.0, %v516_v50  ;;  %vm616_vm4 = vcmp.ge.f32.partialorder %v1671_v44, 0.0 }
 0x218   :  { %1062 = vst [vmem:[#allocation5 + $0x60] sm:$0xff] %v869_v52  ;;  %v874_v60 = vadd.f32 %v1214_v42, %v873_v55  ;;  %v582_v31 = vmul.f32 1.442695, %v541_v58 }
 0x219   :  { %v1216_v59 = vpop.eup %1215  ;;  %v476_v61 = vpop.f32.mrf.mxu2 }
 0x21a   :  { %v1218_v62 = vpop.eup %1217  ;;  %v886_v63 = vmul.f32 %v1216_v59, %v664_v19  ;;  %v1678_v36 = vadd.f32 %v476_v61, %v1504_v0  ;;  %v878_v1 = vsel %vm877_vm5, %v1214_v42, %v874_v60  ;;  %1219 = vpow2.f32 %v582_v31 }
 0x21b   :  { %v665_v2 = vadd.f32 1.0, %v1218_v62  ;;  %v883_v4 = vsel %vm880_vm6, %v882_v32, %v878_v1  ;;  %vm891_vm7 = vweird.f32 %v1216_v59  ;;  %v640_v39 = vsel %vm615_vm15, 1.0, %v1218_v62 }
 0x21c   :  { %v887_v6 = vsub.f32 1.0, %v886_v63  ;;  %v517_v8 = vand.u32 2147483647, %v1678_v36  ;;  %v884_v7 = vmul.f32 %v883_v4, %v638_v3  ;;  %vm892_vm10 = vmor %vm890_vm8, %vm891_vm7  ;;  %vm617_vm9 = vcmp.ge.f32.partialorder %v1678_v36, 0.0 }
 0x21d   :  { %1221 = vrcp.f32 %v665_v2  ;;  %v911_v23 = vand.u32 2147483648, %v665_v2  ;;  %v909_v26 = vand.u32 2147483647, %v665_v2  ;;  %vm905_vm13 = vweird.f32 %v665_v2 }
 0x21e   :  { %v888_v35 = vmul.f32 %v1216_v59, %v887_v6  ;;  %v542_v12 = vsub.f32 0.0, %v517_v8  ;;  %1063 = vst [vmem:[#allocation5 + $0x68] sm:$0xff] %v884_v7 }
 0x21f   :  { %v912_v37 = vor.u32 1.1754944e-38, %v911_v23  ;;  %vm910_vm0 = vcmp.eq.f32.partialorder %v909_v26, 8.507059e+37 }
 0x220   :  { %v889_v13 = vadd.f32 %v1216_v59, %v888_v35  ;;  %v584_v53 = vmul.f32 1.442695, %v542_v12  ;;  %v1220_v47 = vpop.eup %1219 }
 0x221   :  { %v666_v16 = vadd.f32 1.0, %v1220_v47  ;;  %v641_v58 = vsel %vm616_vm4, 1.0, %v1220_v47 }
 0x222   :  { %v893_v15 = vsel %vm892_vm10, %v1216_v59, %v889_v13  ;;  %1223 = vpow2.f32 %v584_v53 }
 0x223   :  { %v1222_v51 = vpop.eup %1221  ;;  %v898_v18 = vsel %vm895_vm11, %v897_v14, %v893_v15  ;;  %1225 = vrcp.f32 %v666_v16  ;;  %v926_v10 = vand.u32 2147483648, %v666_v16  ;;  %v924_v46 = vand.u32 2147483647, %v666_v16 }
 0x224   :  { %v899_v20 = vmul.f32 %v898_v18, %v639_v17  ;;  %v901_v21 = vmul.f32 %v1222_v51, %v665_v2  ;;  %vm906_vm12 = vweird.f32 %v1222_v51  ;;  %vm920_vm2 = vweird.f32 %v666_v16 }
 0x225   :  { %vm907_vm14 = vmor %vm905_vm13, %vm906_vm12  ;;  %v927_v52 = vor.u32 1.1754944e-38, %v926_v10  ;;  %vm925_vm5 = vcmp.eq.f32.partialorder %v924_v46, 8.507059e+37 }
 0x226   :  { %1064 = vst [vmem:[#allocation5 + $0x70] sm:$0xff] %v899_v20  ;;  %v902_v22 = vsub.f32 1.0, %v901_v21 }
 0x227   :  { %v479_v24 = vpop.f32.mrf.mxu3 }
 0x228   :  { %v1684_v25 = vpop.eup %1223  ;;  %v903_v28 = vmul.f32 %v1222_v51, %v902_v22  ;;  %v1687_v27 = vadd.f32 %v479_v24, %v1504_v0 }
 0x229   :  { %v667_v11 = vadd.f32 1.0, %v1684_v25  ;;  %v1226_v29 = vpop.eup %1225  ;;  %v642_v7 = vsel %vm617_vm9, 1.0, %v1684_v25 }
 0x22a   :  { %v904_v30 = vadd.f32 %v1222_v51, %v903_v28  ;;  %v518_v33 = vand.u32 2147483647, %v1687_v27  ;;  %v916_v9 = vmul.f32 %v1226_v29, %v666_v16  ;;  %vm921_vm1 = vweird.f32 %v1226_v29 }
 0x22b   :  { %1227 = vrcp.f32 %v667_v11  ;;  %vm922_vm3 = vmor %vm920_vm2, %vm921_vm1  ;;  %v941_v62 = vand.u32 2147483648, %v667_v11  ;;  %v939_v1 = vand.u32 2147483647, %v667_v11  ;;  %vm935_vm7 = vweird.f32 %v667_v11 }
 0x22c   :  { %v908_v38 = vsel %vm907_vm14, %v1222_v51, %v904_v30  ;;  %v543_v19 = vsub.f32 0.0, %v518_v33  ;;  %v917_v42 = vsub.f32 1.0, %v916_v9  ;;  %vm618_vm14 = vcmp.ge.f32.partialorder %v1687_v27, 0.0 }
 0x22d   :  { %v913_v41 = vsel %vm910_vm0, %v912_v37, %v908_v38  ;;  %v942_v44 = vor.u32 1.1754944e-38, %v941_v62  ;;  %vm940_vm10 = vcmp.eq.f32.partialorder %v939_v1, 8.507059e+37 }
 0x22e   :  { %v914_v43 = vmul.f32 %v913_v41, %v640_v39  ;;  %v586_v45 = vmul.f32 1.442695, %v543_v19  ;;  %v918_v40 = vmul.f32 %v1226_v29, %v917_v42 }
 0x22f   :  { %v482_v49 = vpop.f32.mrf.mxu3 }
 0x230   :  { %1065 = vst [vmem:[#allocation5 + $0x78] sm:$0xff] %v914_v43  ;;  %1229 = vpow2.f32 %v586_v45  ;;  %v1693_v48 = vadd.f32 %v482_v49, %v1504_v0  ;;  %v919_v57 = vadd.f32 %v1226_v29, %v918_v40 }
 0x231   :  { %v1228_v50 = vpop.eup %1227 }
 0x232   :  { %v931_v54 = vmul.f32 %v1228_v50, %v667_v11  ;;  %v519_v55 = vand.u32 2147483647, %v1693_v48  ;;  %v923_v56 = vsel %vm922_vm3, %v1226_v29, %v919_v57  ;;  %vm936_vm6 = vweird.f32 %v1228_v50 }
 0x233   :  { %v928_v59 = vsel %vm925_vm5, %v927_v52, %v923_v56  ;;  %vm937_vm8 = vmor %vm935_vm7, %vm936_vm6  ;;  %vm619_vm3 = vcmp.ge.f32.partialorder %v1693_v48, 0.0 }
 0x234   :  { %v932_v60 = vsub.f32 1.0, %v931_v54  ;;  %v544_v31 = vsub.f32 0.0, %v519_v55  ;;  %v929_v61 = vmul.f32 %v928_v59, %v641_v58 }
 0x236   :  { %v1230_v32 = vpop.eup %1229  ;;  %v933_v63 = vmul.f32 %v1228_v50, %v932_v60  ;;  %v588_v2 = vmul.f32 1.442695, %v544_v31  ;;  %1066 = vst [vmem:[#allocation5 + $0x80] sm:$0xff] %v929_v61 }
 0x237   :  { %v668_v3 = vadd.f32 1.0, %v1230_v32  ;;  %v485_v8 = vpop.f32.mrf.mxu3  ;;  %v643_v29 = vsel %vm618_vm14, 1.0, %v1230_v32 }
 0x238   :  { %v934_v4 = vadd.f32 %v1228_v50, %v933_v63  ;;  %1231 = vpow2.f32 %v588_v2  ;;  %v1700_v35 = vadd.f32 %v485_v8, %v1504_v0 }
 0x239   :  { %1233 = vrcp.f32 %v668_v3  ;;  %v956_v17 = vand.u32 2147483648, %v668_v3  ;;  %v954_v21 = vand.u32 2147483647, %v668_v3  ;;  %vm950_vm12 = vweird.f32 %v668_v3 }
 0x23a   :  { %v938_v6 = vsel %vm937_vm8, %v1228_v50, %v934_v4  ;;  %v520_v12 = vand.u32 2147483647, %v1700_v35  ;;  %vm620_vm8 = vcmp.ge.f32.partialorder %v1700_v35, 0.0 }
 0x23b   :  { %v943_v5 = vsel %vm940_vm10, %v942_v44, %v938_v6  ;;  %v957_v25 = vor.u32 1.1754944e-38, %v956_v17  ;;  %vm955_vm15 = vcmp.eq.f32.partialorder %v954_v21, 8.507059e+37 }
 0x23c   :  { %v944_v34 = vmul.f32 %v943_v5, %v642_v7  ;;  %v545_v14 = vsub.f32 0.0, %v520_v12 }
 0x23e   :  { %v1232_v13 = vpop.eup %1231  ;;  %1067 = vst [vmem:[#allocation5 + $0x88] sm:$0xff] %v944_v34  ;;  %v590_v16 = vmul.f32 1.442695, %v545_v14 }
 0x23f   :  { %v1234_v53 = vpop.eup %1233  ;;  %v669_v47 = vadd.f32 1.0, %v1232_v13  ;;  %v488_v51 = vpop.f32.mrf.mxu3  ;;  %v644_v57 = vsel %vm619_vm3, 1.0, %v1232_v13 }
 0x240   :  { %v946_v15 = vmul.f32 %v1234_v53, %v668_v3  ;;  %v1704_v18 = vadd.f32 %v488_v51, %v1504_v0  ;;  %vm951_vm11 = vweird.f32 %v1234_v53 }
 0x241   :  { %1235 = vrcp.f32 %v669_v47  ;;  %vm952_vm13 = vmor %vm950_vm12, %vm951_vm11  ;;  %v971_v39 = vand.u32 2147483648, %v669_v47  ;;  %v969_v27 = vand.u32 2147483647, %v669_v47  ;;  %vm965_vm1 = vweird.f32 %v669_v47 }
 0x242   :  { %v947_v36 = vsub.f32 1.0, %v946_v15  ;;  %1237 = vpow2.f32 %v590_v16  ;;  %v521_v22 = vand.u32 2147483647, %v1704_v18 }
 0x243   :  { %v972_v40 = vor.u32 1.1754944e-38, %v971_v39  ;;  %vm970_vm4 = vcmp.eq.f32.partialorder %v969_v27, 8.507059e+37 }
 0x244   :  { %v948_v20 = vmul.f32 %v1234_v53, %v947_v36  ;;  %v546_v28 = vsub.f32 0.0, %v521_v22 }
 0x246   :  { %v949_v23 = vadd.f32 %v1234_v53, %v948_v20  ;;  %v592_v33 = vmul.f32 1.442695, %v546_v28 }
 0x247   :  { %v1236_v24 = vpop.eup %1235  ;;  %v491_v19 = vpop.f32.mrf.mxu3 }
 0x248   :  { %v953_v26 = vsel %vm952_vm13, %v1234_v53, %v949_v23  ;;  %v961_v11 = vmul.f32 %v1236_v24, %v669_v47  ;;  %v1238_v37 = vpop.eup %1237  ;;  %1239 = vpow2.f32 %v592_v33  ;;  %v1709_v42 = vadd.f32 %v491_v19, %v1504_v0 }
 0x249   :  { %v958_v30 = vsel %vm955_vm15, %v957_v25, %v953_v26  ;;  %v670_v41 = vadd.f32 1.0, %v1238_v37  ;;  %vm966_vm0 = vweird.f32 %v1236_v24  ;;  %v645_v13 = vsel %vm620_vm8, 1.0, %v1238_v37 }
 0x24a   :  { %v959_v9 = vmul.f32 %v958_v30, %v643_v29  ;;  %v962_v38 = vsub.f32 1.0, %v961_v11  ;;  %v522_v45 = vand.u32 2147483647, %v1709_v42  ;;  %vm967_vm2 = vmor %vm965_vm1, %vm966_vm0  ;;  %vm621_vm13 = vcmp.ge.f32.partialorder %v1704_v18, 0.0 }
 0x24b   :  { %1241 = vrcp.f32 %v670_v41  ;;  %v986_v62 = vand.u32 2147483648, %v670_v41  ;;  %v984_v1 = vand.u32 2147483647, %v670_v41  ;;  %vm980_vm6 = vweird.f32 %v670_v41 }
 0x24c   :  { %1068 = vst [vmem:[#allocation5 + $0x90] sm:$0xff] %v959_v9  ;;  %v963_v43 = vmul.f32 %v1236_v24, %v962_v38  ;;  %v547_v49 = vsub.f32 0.0, %v522_v45 }
 0x24d   :  { %v987_v8 = vor.u32 1.1754944e-38, %v986_v62  ;;  %vm985_vm9 = vcmp.eq.f32.partialorder %v984_v1, 8.507059e+37 }
 0x24e   :  { %v964_v10 = vadd.f32 %v1236_v24, %v963_v43  ;;  %v1240_v50 = vpop.eup %1239  ;;  %v594_v56 = vmul.f32 1.442695, %v547_v49 }
 0x24f   :  { %v671_v55 = vadd.f32 1.0, %v1240_v50  ;;  %v494_v58 = vpop.f32.mrf.mxu3  ;;  %v646_v25 = vsel %vm621_vm13, 1.0, %v1240_v50 }
 0x250   :  { %v968_v46 = vsel %vm967_vm2, %v1236_v24, %v964_v10  ;;  %v1714_v60 = vadd.f32 %v494_v58, %v1504_v0  ;;  %vm622_vm2 = vcmp.ge.f32.partialorder %v1709_v42, 0.0 }
 0x251   :  { %v973_v52 = vsel %vm970_vm4, %v972_v40, %v968_v46  ;;  %v1242_v59 = vpop.eup %1241  ;;  %1243 = vrcp.f32 %v671_v55  ;;  %v1001_v36 = vand.u32 2147483648, %v671_v55  ;;  %v999_v51 = vand.u32 2147483647, %v671_v55 }
 0x252   :  { %v974_v54 = vmul.f32 %v973_v52, %v644_v57  ;;  %v976_v31 = vmul.f32 %v1242_v59, %v670_v41  ;;  %1245 = vpow2.f32 %v594_v56  ;;  %v523_v48 = vand.u32 2147483647, %v1714_v60 }
 0x253   :  { %vm981_vm5 = vweird.f32 %v1242_v59  ;;  %vm995_vm11 = vweird.f32 %v671_v55  ;;  %v1002_v21 = vor.u32 1.1754944e-38, %v1001_v36  ;;  %vm1000_vm14 = vcmp.eq.f32.partialorder %v999_v51, 8.507059e+37 }
 0x254   :  { %1069 = vst [vmem:[#allocation5 + $0x98] sm:$0xff] %v974_v54  ;;  %v977_v61 = vsub.f32 1.0, %v976_v31  ;;  %v548_v32 = vsub.f32 0.0, %v523_v48  ;;  %vm982_vm7 = vmor %vm980_vm6, %vm981_vm5 }
 0x256   :  { %v978_v63 = vmul.f32 %v1242_v59, %v977_v61  ;;  %v596_v2 = vmul.f32 1.442695, %v548_v32 }
 0x257   :  { %v1244_v3 = vpop.eup %1243  ;;  %v497_v44 = vpop.f32.mrf.mxu3 }
 0x258   :  { %v979_v4 = vadd.f32 %v1242_v59, %v978_v63  ;;  %v1246_v6 = vpop.eup %1245  ;;  %v991_v7 = vmul.f32 %v1244_v3, %v671_v55  ;;  %1247 = vpow2.f32 %v596_v2  ;;  %v1718_v5 = vadd.f32 %v497_v44, %v1504_v0 }
 0x259   :  { %v672_v12 = vadd.f32 1.0, %v1246_v6  ;;  %vm996_vm10 = vweird.f32 %v1244_v3  ;;  %v647_v10 = vsel %vm622_vm2, 1.0, %v1246_v6 }
 0x25a   :  { %v983_v34 = vsel %vm982_vm7, %v1242_v59, %v979_v4  ;;  %v992_v47 = vsub.f32 1.0, %v991_v7  ;;  %v524_v14 = vand.u32 2147483647, %v1718_v5  ;;  %vm997_vm12 = vmor %vm995_vm11, %vm996_vm10  ;;  %vm623_vm7 = vcmp.ge.f32.partialorder %v1714_v60, 0.0 }
 0x25b   :  { %v988_v53 = vsel %vm985_vm9, %v987_v8, %v983_v34  ;;  %1249 = vrcp.f32 %v672_v12  ;;  %v1016_v30 = vand.u32 2147483648, %v672_v12  ;;  %v1014_v9 = vand.u32 2147483647, %v672_v12 }
 0x25c   :  { %v989_v15 = vmul.f32 %v988_v53, %v645_v13  ;;  %v993_v16 = vmul.f32 %v1244_v3, %v992_v47  ;;  %v549_v17 = vsub.f32 0.0, %v524_v14  ;;  %vm1010_vm0 = vweird.f32 %v672_v12 }
 0x25d   :  { %v1017_v41 = vor.u32 1.1754944e-38, %v1016_v30  ;;  %vm1015_vm3 = vcmp.eq.f32.partialorder %v1014_v9, 8.507059e+37 }
 0x25e   :  { %1070 = vst [vmem:[#allocation5 + $0xa0] sm:$0xff] %v989_v15  ;;  %v1248_v0 = vpop.eup %1247  ;;  %v994_v20 = vadd.f32 %v1244_v3, %v993_v16  ;;  %v598_v35 = vmul.f32 1.442695, %v549_v17 }
 0x25f   :  { %v673_v22 = vadd.f32 1.0, %v1248_v0  ;;  %v648_v56 = vsel %vm623_vm7, 1.0, %v1248_v0 }
 0x260   :  { %v998_v23 = vsel %vm997_vm12, %v1244_v3, %v994_v20  ;;  %1251 = vpow2.f32 %v598_v35  ;;  %vm624_vm12 = vcmp.ge.f32.partialorder %v1718_v5, 0.0 }
 0x261   :  { %v1250_v24 = vpop.eup %1249  ;;  %v1003_v28 = vsel %vm1000_vm14, %v1002_v21, %v998_v23  ;;  %1253 = vrcp.f32 %v673_v22  ;;  %v1031_v40 = vand.u32 2147483648, %v673_v22  ;;  %v1029_v50 = vand.u32 2147483647, %v673_v22 }
 0x262   :  { %v1004_v26 = vmul.f32 %v1003_v28, %v646_v25  ;;  %v1006_v11 = vmul.f32 %v1250_v24, %v672_v12  ;;  %vm1011_vm15 = vweird.f32 %v1250_v24  ;;  %vm1025_vm5 = vweird.f32 %v673_v22 }
 0x263   :  { %vm1012_vm1 = vmor %vm1010_vm0, %vm1011_vm15  ;;  %v1032_v54 = vor.u32 1.1754944e-38, %v1031_v40  ;;  %vm1030_vm8 = vcmp.eq.f32.partialorder %v1029_v50, 8.507059e+37 }
 0x264   :  { %1071 = vst [vmem:[#allocation5 + $0xa8] sm:$0xff] %v1004_v26  ;;  %v1007_v29 = vsub.f32 1.0, %v1006_v11 }
 0x266   :  { %v1252_v33 = vpop.eup %1251  ;;  %v1008_v37 = vmul.f32 %v1250_v24, %v1007_v29 }
 0x267   :  { %v1254_v38 = vpop.eup %1253  ;;  %v674_v19 = vadd.f32 1.0, %v1252_v33  ;;  %v649_v1 = vsel %vm624_vm12, 1.0, %v1252_v33 }
 0x268   :  { %v1009_v39 = vadd.f32 %v1250_v24, %v1008_v37  ;;  %v1021_v18 = vmul.f32 %v1254_v38, %v673_v22  ;;  %vm1026_vm4 = vweird.f32 %v1254_v38 }
 0x269   :  { %1255 = vrcp.f32 %v674_v19  ;;  %vm1027_vm6 = vmor %vm1025_vm5, %vm1026_vm4  ;;  %v1046_v48 = vand.u32 2147483648, %v674_v19  ;;  %v1044_v62 = vand.u32 2147483647, %v674_v19  ;;  %vm1040_vm10 = vweird.f32 %v674_v19 }
 0x26a   :  { %v1013_v43 = vsel %vm1012_vm1, %v1250_v24, %v1009_v39  ;;  %v1022_v27 = vsub.f32 1.0, %v1021_v18 }
 0x26b   :  { %v1018_v45 = vsel %vm1015_vm3, %v1017_v41, %v1013_v43  ;;  %v1047_v63 = vor.u32 1.1754944e-38, %v1046_v48  ;;  %vm1045_vm13 = vcmp.eq.f32.partialorder %v1044_v62, 8.507059e+37 }
 0x26c   :  { %v1019_v46 = vmul.f32 %v1018_v45, %v647_v10  ;;  %v1023_v49 = vmul.f32 %v1254_v38, %v1022_v27 }
 0x26e   :  { %1072 = vst [vmem:[#allocation5 + $0xb0] sm:$0xff] %v1019_v46  ;;  %v1024_v57 = vadd.f32 %v1254_v38, %v1023_v49 }
 0x26f   :  { %v1256_v52 = vpop.eup %1255 }
 0x270   :  { %v1028_v55 = vsel %vm1027_vm6, %v1254_v38, %v1024_v57  ;;  %v1036_v42 = vmul.f32 %v1256_v52, %v674_v19  ;;  %vm1041_vm9 = vweird.f32 %v1256_v52 }
 0x271   :  { %v1033_v58 = vsel %vm1030_vm8, %v1032_v54, %v1028_v55  ;;  %vm1042_vm11 = vmor %vm1040_vm10, %vm1041_vm9 }
 0x272   :  { %v1034_v59 = vmul.f32 %v1033_v58, %v648_v56  ;;  %v1037_v31 = vsub.f32 1.0, %v1036_v42 }
 0x274   :  { %1073 = vst [vmem:[#allocation5 + $0xb8] sm:$0xff] %v1034_v59  ;;  %v1038_v61 = vmul.f32 %v1256_v52, %v1037_v31 }
 0x276   :  { %v1039_v32 = vadd.f32 %v1256_v52, %v1038_v61 }
 0x278   :  { %v1043_v60 = vsel %vm1042_vm11, %v1256_v52, %v1039_v32 }
 0x279   :  { %v1048_v2 = vsel %vm1045_vm13, %v1047_v63, %v1043_v60 }
 0x27a   :  { %v1049_v3 = vmul.f32 %v1048_v2, %v649_v1 }
 0x27c   :  { %1074 = vst [vmem:[#allocation5 + $0xc0] sm:$0xff] %v1049_v3 }
 0x27d   :  { %1087 = dma.vmem_to_hbm [thread:$0]  %s1080_s25, 3200, %s1082_s27, [#allocation4], %s1310_s20, %s1310_s20, %s1311_s21  }
 0x27e   :  { %1307 = dma.done.wait [#allocation4], 3200  }
 0x27f   :  { %1308 = vsyncadd [#allocation4], 4294964096 }
 0x280   :  { %1092 = vsyncpa [#allocation3], 1 }
 0x281   :  { %1093 = vsyncpa [#allocation4], 1 }

</bundles_post_ra>
